<compile_context>
chip_gen: v7x
topology: tpu7x:2x2x1
jax: 0.10.0
libtpu: 0.0.40
codegen_flags: <defaults>
</compile_context>

<pallas_src>
import math
from functools import partial

import jax
import jax.numpy as jnp
from jax.experimental import pallas as pl
from jax.experimental.pallas import tpu as pltpu

_INV_SQRT2 = 1.0 / math.sqrt(2.0)


def _bert_layer_kernel(x_ref, mask_ref,
                       g1_ref, be1_ref,
                       wq_ref, bq_ref, wk_ref, bk_ref, wv_ref, bv_ref,
                       wp_ref, bp_ref,
                       w1_ref, b1_ref, w2_ref, b2_ref,
                       out_ref, scores_ref,
                       qkv_ref, ctx_ref,
                       *, n_heads, ffn_tile_rows, n_ffn_tiles):
    x = x_ref[0].astype(jnp.float32)          # (S, H) f32
    mask = mask_ref[0].astype(jnp.float32)    # (1, S)
    S, H = x.shape
    hd = H // n_heads
    inv_sqrt_hd = 1.0 / math.sqrt(hd)
    eps = 1e-12

    g1 = g1_ref[...]                          # (1, H) f32
    be1 = be1_ref[...]

    def layer_norm(v):                        # f32 in / f32 out
        mu = jnp.mean(v, axis=-1, keepdims=True)
        var = jnp.mean((v - mu) ** 2, axis=-1, keepdims=True)
        return (v - mu) * jax.lax.rsqrt(var + eps) * g1 + be1

    def mm(a_f32, w_ref, b_ref):              # bf16 MXU operands, f32 accumulate
        return jnp.dot(a_f32.astype(jnp.bfloat16), w_ref[...],
                       preferred_element_type=jnp.float32) + b_ref[...]

    # ---------------- attention (pre-norm) ----------------
    xn = layer_norm(x)
    q = mm(xn, wq_ref, bq_ref) * inv_sqrt_hd  # fold 1/sqrt(hd) into q once
    k = mm(xn, wk_ref, bk_ref)
    v = mm(xn, wv_ref, bv_ref)

    # Head split via cheap slice stores into a head-major bf16 VMEM scratch
    # (no tiny per-head matmuls, no concatenate).  qkv_ref: (3, n_heads, S, hd) bf16.
    for h in range(n_heads):
        sl = slice(h * hd, (h + 1) * hd)
        qkv_ref[0, h] = q[:, sl].astype(jnp.bfloat16)
        qkv_ref[1, h] = k[:, sl].astype(jnp.bfloat16)
        qkv_ref[2, h] = v[:, sl].astype(jnp.bfloat16)

    qh = qkv_ref[0]                           # (n_heads, S, hd) bf16
    kh = qkv_ref[1]
    vh = qkv_ref[2]

    # One batched MXU matmul for all heads' scores: (n_heads, S, S) f32.
    s = jax.lax.dot_general(qh, kh, (((2,), (2,)), ((0,), (0,))),
                            preferred_element_type=jnp.float32)
    neg = (10000.0 * (1.0 - mask))[None]      # (1, 1, S) additive mask bias
    s = s - neg
    s = s - jnp.max(s, axis=-1, keepdims=True)
    e = jnp.exp(s)
    denom = jnp.sum(e, axis=-1, keepdims=True)
    r = pl.reciprocal(denom, approx=True)     # EUP reciprocal ...
    r = r * (2.0 - denom * r)                 # ... + one Newton step (~f32 accurate)
    p = e * r                                 # (n_heads, S, S) f32 probabilities
    scores_ref[0] = p.astype(scores_ref.dtype)  # single lane-dense store of all heads

    # One batched MXU matmul for all heads' context: (n_heads, S, hd) f32.
    ctx = jax.lax.dot_general(p.astype(jnp.bfloat16), vh,
                              (((2,), (1,)), ((0,), (0,))),
                              preferred_element_type=jnp.float32)

    # Head merge via slice stores into an (S, H) bf16 scratch (feeds the proj matmul).
    for h in range(n_heads):
        ctx_ref[:, h * hd:(h + 1) * hd] = ctx[h].astype(jnp.bfloat16)

    h_proj = jnp.dot(ctx_ref[...], wp_ref[...],
                     preferred_element_type=jnp.float32) + bp_ref[...]
    out1 = x + h_proj                         # drop1 is identity in eval mode

    # -------- feed-forward (pre-norm, reuses norm1 as in the reference code) --------
    def ffn_of(rows_f32):
        xn2 = layer_norm(rows_f32)
        u = mm(xn2, w1_ref, b1_ref)
        g = u * 0.5 * (1.0 + jax.lax.erf(u * _INV_SQRT2))   # exact-erf GELU, f32
        ff = mm(g, w2_ref, b2_ref)
        return rows_f32 + ff                  # drop2 is identity

    if n_ffn_tiles == 1:
        out_ref[0] = ffn_of(out1).astype(out_ref.dtype)
    else:
        # Row-tile the FFN so the (rows, 4H) intermediate stays small.
        out_ref[0] = out1.astype(out_ref.dtype)

        def body(t, carry):
            row0 = pl.multiple_of(t * ffn_tile_rows, ffn_tile_rows)
            rows = out_ref[0, pl.ds(row0, ffn_tile_rows), :].astype(jnp.float32)
            out_ref[0, pl.ds(row0, ffn_tile_rows), :] = ffn_of(rows).astype(out_ref.dtype)
            return carry

        jax.lax.fori_loop(0, n_ffn_tiles, body, 0)


def bert_layer(x, mask, params, n_heads):
    B, S, H = x.shape
    assert H % n_heads == 0
    hd = H // n_heads
    D = 4 * H

    # FFN row tiling (only kicks in for long sequences).
    if S > 256 and S % 256 == 0:
        ffn_tile_rows = 256
    else:
        ffn_tile_rows = S
    n_ffn_tiles = S // ffn_tile_rows

    kernel = partial(_bert_layer_kernel, n_heads=n_heads,
                     ffn_tile_rows=ffn_tile_rows, n_ffn_tiles=n_ffn_tiles)
    mask3 = mask.reshape(B, 1, S)

    # Mixed precision: weight matrices go to the MXU (and are DMA'd) as bf16;
    # biases and LayerNorm params stay f32.
    bf16 = jnp.bfloat16
    wq = params["wq"].astype(bf16); wk = params["wk"].astype(bf16)
    wv = params["wv"].astype(bf16); wp = params["wp"].astype(bf16)
    w1 = params["w1"].astype(bf16); w2 = params["w2"].astype(bf16)

    def rep(shape):  # constant-index (replicated) operand
        return pl.BlockSpec(shape, lambda b, _n=len(shape): (0,) * _n)

    in_specs = [
        pl.BlockSpec((1, S, H), lambda b: (b, 0, 0)),   # x
        pl.BlockSpec((1, 1, S), lambda b: (b, 0, 0)),   # mask
        rep((1, H)), rep((1, H)),                       # gamma1, beta1
        rep((H, H)), rep((1, H)),                       # Wq (bf16), bq
        rep((H, H)), rep((1, H)),                       # Wk, bk
        rep((H, H)), rep((1, H)),                       # Wv, bv
        rep((H, H)), rep((1, H)),                       # Wproj, bproj
        rep((H, D)), rep((1, D)),                       # W1, b1
        rep((D, H)), rep((1, H)),                       # W2, b2
    ]
    out_specs = (
        pl.BlockSpec((1, S, H), lambda b: (b, 0, 0)),
        pl.BlockSpec((1, n_heads, S, S), lambda b: (b, 0, 0, 0)),
    )
    out_shape = (
        jax.ShapeDtypeStruct((B, S, H), x.dtype),
        jax.ShapeDtypeStruct((B, n_heads, S, S), jnp.float32),
    )
    scratch_shapes = [
        pltpu.VMEM((3, n_heads, S, hd), jnp.bfloat16),  # head-major q/k/v
        pltpu.VMEM((S, H), jnp.bfloat16),               # merged attention context
    ]
    fn = pl.pallas_call(
        kernel,
        grid=(B,),
        in_specs=in_specs,
        out_specs=out_specs,
        out_shape=out_shape,
        scratch_shapes=scratch_shapes,
        compiler_params=pltpu.CompilerParams(
            dimension_semantics=("parallel",),
            vmem_limit_bytes=64 * 1024 * 1024,
        ),
    )
    return fn(x, mask3,
              params["g1"], params["be1"],
              wq, params["bq"], wk, params["bk"],
              wv, params["bv"], wp, params["bp"],
              w1, params["b1"], w2, params["b2"])


def ref_forward(x, mask, params, n_heads):
    """Pure-JAX f32 reference mirroring the PyTorch forward (eval mode)."""
    def ln(v, g, b):
        mu = v.mean(-1, keepdims=True)
        var = ((v - mu) ** 2).mean(-1, keepdims=True)
        return (v - mu) / jnp.sqrt(var + 1e-12) * g + b

    B, S, H = x.shape
    hd = H // n_heads
    xn = ln(x, params["g1"][0], params["be1"][0])
    q = xn @ params["wq"] + params["bq"][0]
    k = xn @ params["wk"] + params["bk"][0]
    v = xn @ params["wv"] + params["bv"][0]

    def split(t):
        return t.reshape(B, S, n_heads, hd).transpose(0, 2, 1, 3)

    q, k, v = split(q), split(k), split(v)
    s = (q @ k.transpose(0, 1, 3, 2)) / jnp.sqrt(jnp.float32(hd))
    s = s - 10000.0 * (1.0 - mask[:, None, None, :])
    p = jax.nn.softmax(s, axis=-1)
    ctx = (p @ v).transpose(0, 2, 1, 3).reshape(B, S, H)
    out1 = x + (ctx @ params["wp"] + params["bp"][0])
    xn2 = ln(out1, params["g1"][0], params["be1"][0])
    u = xn2 @ params["w1"] + params["b1"][0]
    g = u * 0.5 * (1.0 + jax.lax.erf(u / jnp.sqrt(2.0)))
    out = out1 + (g @ params["w2"] + params["b2"][0])
    return out, p


def init_params(key, H):
    D = 4 * H
    ks = jax.random.split(key, 12)
    scale = 0.02
    return {
        "g1":  jnp.ones((1, H), jnp.float32),
        "be1": jnp.zeros((1, H), jnp.float32),
        "wq": scale * jax.random.normal(ks[0], (H, H), jnp.float32),
        "bq": scale * jax.random.normal(ks[1], (1, H), jnp.float32),
        "wk": scale * jax.random.normal(ks[2], (H, H), jnp.float32),
        "bk": scale * jax.random.normal(ks[3], (1, H), jnp.float32),
        "wv": scale * jax.random.normal(ks[4], (H, H), jnp.float32),
        "bv": scale * jax.random.normal(ks[5], (1, H), jnp.float32),
        "wp": scale * jax.random.normal(ks[6], (H, H), jnp.float32),
        "bp": scale * jax.random.normal(ks[7], (1, H), jnp.float32),
        "w1": scale * jax.random.normal(ks[8], (H, D), jnp.float32),
        "b1": scale * jax.random.normal(ks[9], (1, D), jnp.float32),
        "w2": scale * jax.random.normal(ks[10], (D, H), jnp.float32),
        "b2": scale * jax.random.normal(ks[11], (1, H), jnp.float32),
    }


if __name__ == "__main__":
    B, S, H, n_heads = 2, 8, 32, 4

    key = jax.random.PRNGKey(0)
    k_x, k_p = jax.random.split(key)
    x = jax.random.normal(k_x, (B, S, H), jnp.float32)
    # attention mask: 1.0 = keep, 0.0 = masked; mask out last 2 keys of batch 1
    mask = jnp.ones((B, S), jnp.float32).at[1, -2:].set(0.0)

    params = init_params(k_p, H)

    out, scores = bert_layer(x, mask, params, n_heads)
    out = jax.block_until_ready(out)
    scores = jax.block_until_ready(scores)

    out_exp, scores_exp = ref_forward(x, mask, params, n_heads)
    assert out.shape == (B, S, H) and scores.shape == (B, n_heads, S, S)
    # bf16 MXU operands (f32 accumulate) vs. the pure-f32 reference -> ~1e-4..1e-3 abs error.
    assert jnp.allclose(out, out_exp, rtol=5e-3, atol=5e-3), \
        float(jnp.max(jnp.abs(out - out_exp)))
    assert jnp.allclose(scores, scores_exp, rtol=5e-3, atol=5e-3), \
        float(jnp.max(jnp.abs(scores - scores_exp)))

    print("KERNEL_OK")
</pallas_src>

<mosaic_0001>
module attributes {stable_mosaic.version = 11 : i64} {
  func.func @_bert_layer_kernel(%arg0: i32, %arg1: memref<1x8x32xf32, #tpu.memory_space<vmem>>, %arg2: memref<1x1x8xf32, #tpu.memory_space<vmem>>, %arg3: memref<1x32xf32, #tpu.memory_space<vmem>>, %arg4: memref<1x32xf32, #tpu.memory_space<vmem>>, %arg5: memref<32x32xbf16, #tpu.memory_space<vmem>>, %arg6: memref<1x32xf32, #tpu.memory_space<vmem>>, %arg7: memref<32x32xbf16, #tpu.memory_space<vmem>>, %arg8: memref<1x32xf32, #tpu.memory_space<vmem>>, %arg9: memref<32x32xbf16, #tpu.memory_space<vmem>>, %arg10: memref<1x32xf32, #tpu.memory_space<vmem>>, %arg11: memref<32x32xbf16, #tpu.memory_space<vmem>>, %arg12: memref<1x32xf32, #tpu.memory_space<vmem>>, %arg13: memref<32x128xbf16, #tpu.memory_space<vmem>>, %arg14: memref<1x128xf32, #tpu.memory_space<vmem>>, %arg15: memref<128x32xbf16, #tpu.memory_space<vmem>>, %arg16: memref<1x32xf32, #tpu.memory_space<vmem>>, %arg17: memref<1x8x32xf32, #tpu.memory_space<vmem>>, %arg18: memref<1x4x8x8xf32, #tpu.memory_space<vmem>>, %arg19: memref<3x4x8x8xbf16, #tpu.memory_space<vmem>>, %arg20: memref<8x32xbf16, #tpu.memory_space<vmem>>) attributes {dimension_semantics = [#tpu.dimension_semantics<parallel>], iteration_bounds = array<i64: 2>, scalar_prefetch = 0 : i64, scratch_operands = 2 : i64, tpu.core_type = #tpu.core_type<tc>, window_params = [{transform_indices = @transform_0, window_bounds = array<i64: 1, 8, 32>}, {transform_indices = @transform_1, window_bounds = array<i64: 1, 1, 8>}, {pipeline_mode = #tpu.pipeline_mode<synchronous>, transform_indices = @transform_2, window_bounds = array<i64: 1, 32>}, {pipeline_mode = #tpu.pipeline_mode<synchronous>, transform_indices = @transform_3, window_bounds = array<i64: 1, 32>}, {pipeline_mode = #tpu.pipeline_mode<synchronous>, transform_indices = @transform_4, window_bounds = array<i64: 32, 32>}, {pipeline_mode = #tpu.pipeline_mode<synchronous>, transform_indices = @transform_5, window_bounds = array<i64: 1, 32>}, {pipeline_mode = #tpu.pipeline_mode<synchronous>, transform_indices = @transform_6, window_bounds = array<i64: 32, 32>}, {pipeline_mode = #tpu.pipeline_mode<synchronous>, transform_indices = @transform_7, window_bounds = array<i64: 1, 32>}, {pipeline_mode = #tpu.pipeline_mode<synchronous>, transform_indices = @transform_8, window_bounds = array<i64: 32, 32>}, {pipeline_mode = #tpu.pipeline_mode<synchronous>, transform_indices = @transform_9, window_bounds = array<i64: 1, 32>}, {pipeline_mode = #tpu.pipeline_mode<synchronous>, transform_indices = @transform_10, window_bounds = array<i64: 32, 32>}, {pipeline_mode = #tpu.pipeline_mode<synchronous>, transform_indices = @transform_11, window_bounds = array<i64: 1, 32>}, {pipeline_mode = #tpu.pipeline_mode<synchronous>, transform_indices = @transform_12, window_bounds = array<i64: 32, 128>}, {pipeline_mode = #tpu.pipeline_mode<synchronous>, transform_indices = @transform_13, window_bounds = array<i64: 1, 128>}, {pipeline_mode = #tpu.pipeline_mode<synchronous>, transform_indices = @transform_14, window_bounds = array<i64: 128, 32>}, {pipeline_mode = #tpu.pipeline_mode<synchronous>, transform_indices = @transform_15, window_bounds = array<i64: 1, 32>}, {transform_indices = @transform_16, window_bounds = array<i64: 1, 8, 32>}, {transform_indices = @transform_17, window_bounds = array<i64: 1, 4, 8, 8>}]} {
    %c0 = arith.constant 0 : index
    %c0_0 = arith.constant 0 : index
    %c0_1 = arith.constant 0 : index
    %0 = vector.load %arg1[%c0, %c0_0, %c0_1] : memref<1x8x32xf32, #tpu.memory_space<vmem>>, vector<1x8x32xf32>
    %1 = vector.shape_cast %0 : vector<1x8x32xf32> to vector<8x32xf32>
    %c0_2 = arith.constant 0 : index
    %c0_3 = arith.constant 0 : index
    %c0_4 = arith.constant 0 : index
    %2 = vector.load %arg2[%c0_2, %c0_3, %c0_4] : memref<1x1x8xf32, #tpu.memory_space<vmem>>, vector<1x1x8xf32>
    %3 = vector.shape_cast %2 : vector<1x1x8xf32> to vector<1x8xf32>
    %c0_5 = arith.constant 0 : index
    %c0_6 = arith.constant 0 : index
    %4 = vector.load %arg3[%c0_5, %c0_6] : memref<1x32xf32, #tpu.memory_space<vmem>>, vector<1x32xf32>
    %c0_7 = arith.constant 0 : index
    %c0_8 = arith.constant 0 : index
    %5 = vector.load %arg4[%c0_7, %c0_8] : memref<1x32xf32, #tpu.memory_space<vmem>>, vector<1x32xf32>
    %cst = arith.constant dense<0.000000e+00> : vector<8xf32>
    %6 = vector.multi_reduction <add>, %1, %cst [1] : vector<8x32xf32> to vector<8xf32>
    %7 = vector.shape_cast %6 : vector<8xf32> to vector<8x1xf32>
    %cst_9 = arith.constant 3.200000e+01 : f32
    %8 = vector.broadcast %cst_9 : f32 to vector<8x1xf32>
    %9 = arith.divf %7, %8 : vector<8x1xf32>
    %10 = vector.broadcast %9 : vector<8x1xf32> to vector<8x32xf32>
    %11 = arith.subf %1, %10 : vector<8x32xf32>
    %12 = arith.mulf %11, %11 : vector<8x32xf32>
    %cst_10 = arith.constant dense<0.000000e+00> : vector<8xf32>
    %13 = vector.multi_reduction <add>, %12, %cst_10 [1] : vector<8x32xf32> to vector<8xf32>
    %14 = vector.shape_cast %13 : vector<8xf32> to vector<8x1xf32>
    %cst_11 = arith.constant 3.200000e+01 : f32
    %15 = vector.broadcast %cst_11 : f32 to vector<8x1xf32>
    %16 = arith.divf %14, %15 : vector<8x1xf32>
    %17 = vector.broadcast %9 : vector<8x1xf32> to vector<8x32xf32>
    %18 = arith.subf %1, %17 : vector<8x32xf32>
    %cst_12 = arith.constant 9.99999996E-13 : f32
    %19 = vector.broadcast %cst_12 : f32 to vector<8x1xf32>
    %20 = arith.addf %16, %19 : vector<8x1xf32>
    %21 = math.rsqrt %20 : vector<8x1xf32>
    %22 = vector.broadcast %21 : vector<8x1xf32> to vector<8x32xf32>
    %23 = arith.mulf %18, %22 : vector<8x32xf32>
    %24 = vector.broadcast %4 : vector<1x32xf32> to vector<8x32xf32>
    %25 = arith.mulf %23, %24 : vector<8x32xf32>
    %26 = vector.broadcast %5 : vector<1x32xf32> to vector<8x32xf32>
    %27 = arith.addf %25, %26 : vector<8x32xf32>
    %28 = arith.truncf %27 : vector<8x32xf32> to vector<8x32xbf16>
    %c0_13 = arith.constant 0 : index
    %c0_14 = arith.constant 0 : index
    %29 = vector.load %arg5[%c0_13, %c0_14] : memref<32x32xbf16, #tpu.memory_space<vmem>>, vector<32x32xbf16>
    %cst_15 = arith.constant dense<0.000000e+00> : vector<8x32xf32>
    %30 = tpu.matmul %28, %29, %cst_15 {dimension_numbers = #tpu.dot_dimension_numbers<[1], [0], [0], [1], [0, 0, 1, 1], [], []>} : vector<8x32xbf16>, vector<32x32xbf16>, vector<8x32xf32> -> vector<8x32xf32>
    %c0_16 = arith.constant 0 : index
    %c0_17 = arith.constant 0 : index
    %31 = vector.load %arg6[%c0_16, %c0_17] : memref<1x32xf32, #tpu.memory_space<vmem>>, vector<1x32xf32>
    %32 = vector.broadcast %31 : vector<1x32xf32> to vector<8x32xf32>
    %33 = arith.addf %30, %32 : vector<8x32xf32>
    %cst_18 = arith.constant 0.353553385 : f32
    %34 = vector.broadcast %cst_18 : f32 to vector<8x32xf32>
    %35 = arith.mulf %33, %34 : vector<8x32xf32>
    %36 = arith.truncf %27 : vector<8x32xf32> to vector<8x32xbf16>
    %c0_19 = arith.constant 0 : index
    %c0_20 = arith.constant 0 : index
    %37 = vector.load %arg7[%c0_19, %c0_20] : memref<32x32xbf16, #tpu.memory_space<vmem>>, vector<32x32xbf16>
    %cst_21 = arith.constant dense<0.000000e+00> : vector<8x32xf32>
    %38 = tpu.matmul %36, %37, %cst_21 {dimension_numbers = #tpu.dot_dimension_numbers<[1], [0], [0], [1], [0, 0, 1, 1], [], []>} : vector<8x32xbf16>, vector<32x32xbf16>, vector<8x32xf32> -> vector<8x32xf32>
    %c0_22 = arith.constant 0 : index
    %c0_23 = arith.constant 0 : index
    %39 = vector.load %arg8[%c0_22, %c0_23] : memref<1x32xf32, #tpu.memory_space<vmem>>, vector<1x32xf32>
    %40 = vector.broadcast %39 : vector<1x32xf32> to vector<8x32xf32>
    %41 = arith.addf %38, %40 : vector<8x32xf32>
    %42 = arith.truncf %27 : vector<8x32xf32> to vector<8x32xbf16>
    %c0_24 = arith.constant 0 : index
    %c0_25 = arith.constant 0 : index
    %43 = vector.load %arg9[%c0_24, %c0_25] : memref<32x32xbf16, #tpu.memory_space<vmem>>, vector<32x32xbf16>
    %cst_26 = arith.constant dense<0.000000e+00> : vector<8x32xf32>
    %44 = tpu.matmul %42, %43, %cst_26 {dimension_numbers = #tpu.dot_dimension_numbers<[1], [0], [0], [1], [0, 0, 1, 1], [], []>} : vector<8x32xbf16>, vector<32x32xbf16>, vector<8x32xf32> -> vector<8x32xf32>
    %c0_27 = arith.constant 0 : index
    %c0_28 = arith.constant 0 : index
    %45 = vector.load %arg10[%c0_27, %c0_28] : memref<1x32xf32, #tpu.memory_space<vmem>>, vector<1x32xf32>
    %46 = vector.broadcast %45 : vector<1x32xf32> to vector<8x32xf32>
    %47 = arith.addf %44, %46 : vector<8x32xf32>
    %48 = vector.extract_strided_slice %35 {offsets = [0, 0], sizes = [8, 8], strides = [1, 1]} : vector<8x32xf32> to vector<8x8xf32>
    %49 = arith.truncf %48 : vector<8x8xf32> to vector<8x8xbf16>
    %c0_29 = arith.constant 0 : index
    %c0_30 = arith.constant 0 : index
    %c0_31 = arith.constant 0 : index
    %c0_32 = arith.constant 0 : index
    %50 = vector.load %arg19[%c0_29, %c0_30, %c0_31, %c0_32] : memref<3x4x8x8xbf16, #tpu.memory_space<vmem>>, vector<1x1x8x8xbf16>
    %51 = vector.shape_cast %50 : vector<1x1x8x8xbf16> to vector<8x8xbf16>
    %52 = vector.shape_cast %49 : vector<8x8xbf16> to vector<1x1x8x8xbf16>
    tpu.vector_store %arg19[%c0_29, %c0_30, %c0_31, %c0_32], %52 {strides = array<i32>} : memref<3x4x8x8xbf16, #tpu.memory_space<vmem>>, vector<1x1x8x8xbf16>,
    %53 = vector.extract_strided_slice %41 {offsets = [0, 0], sizes = [8, 8], strides = [1, 1]} : vector<8x32xf32> to vector<8x8xf32>
    %54 = arith.truncf %53 : vector<8x8xf32> to vector<8x8xbf16>
    %c1 = arith.constant 1 : index
    %c0_33 = arith.constant 0 : index
    %c0_34 = arith.constant 0 : index
    %c0_35 = arith.constant 0 : index
    %55 = vector.load %arg19[%c1, %c0_33, %c0_34, %c0_35] : memref<3x4x8x8xbf16, #tpu.memory_space<vmem>>, vector<1x1x8x8xbf16>
    %56 = vector.shape_cast %55 : vector<1x1x8x8xbf16> to vector<8x8xbf16>
    %57 = vector.shape_cast %54 : vector<8x8xbf16> to vector<1x1x8x8xbf16>
    tpu.vector_store %arg19[%c1, %c0_33, %c0_34, %c0_35], %57 {strides = array<i32>} : memref<3x4x8x8xbf16, #tpu.memory_space<vmem>>, vector<1x1x8x8xbf16>,
    %58 = vector.extract_strided_slice %47 {offsets = [0, 0], sizes = [8, 8], strides = [1, 1]} : vector<8x32xf32> to vector<8x8xf32>
    %59 = arith.truncf %58 : vector<8x8xf32> to vector<8x8xbf16>
    %c2 = arith.constant 2 : index
    %c0_36 = arith.constant 0 : index
    %c0_37 = arith.constant 0 : index
    %c0_38 = arith.constant 0 : index
    %60 = vector.load %arg19[%c2, %c0_36, %c0_37, %c0_38] : memref<3x4x8x8xbf16, #tpu.memory_space<vmem>>, vector<1x1x8x8xbf16>
    %61 = vector.shape_cast %60 : vector<1x1x8x8xbf16> to vector<8x8xbf16>
    %62 = vector.shape_cast %59 : vector<8x8xbf16> to vector<1x1x8x8xbf16>
    tpu.vector_store %arg19[%c2, %c0_36, %c0_37, %c0_38], %62 {strides = array<i32>} : memref<3x4x8x8xbf16, #tpu.memory_space<vmem>>, vector<1x1x8x8xbf16>,
    %63 = vector.extract_strided_slice %35 {offsets = [0, 8], sizes = [8, 8], strides = [1, 1]} : vector<8x32xf32> to vector<8x8xf32>
    %64 = arith.truncf %63 : vector<8x8xf32> to vector<8x8xbf16>
    %c0_39 = arith.constant 0 : index
    %c1_40 = arith.constant 1 : index
    %c0_41 = arith.constant 0 : index
    %c0_42 = arith.constant 0 : index
    %65 = vector.load %arg19[%c0_39, %c1_40, %c0_41, %c0_42] : memref<3x4x8x8xbf16, #tpu.memory_space<vmem>>, vector<1x1x8x8xbf16>
    %66 = vector.shape_cast %65 : vector<1x1x8x8xbf16> to vector<8x8xbf16>
    %67 = vector.shape_cast %64 : vector<8x8xbf16> to vector<1x1x8x8xbf16>
    tpu.vector_store %arg19[%c0_39, %c1_40, %c0_41, %c0_42], %67 {strides = array<i32>} : memref<3x4x8x8xbf16, #tpu.memory_space<vmem>>, vector<1x1x8x8xbf16>,
    %68 = vector.extract_strided_slice %41 {offsets = [0, 8], sizes = [8, 8], strides = [1, 1]} : vector<8x32xf32> to vector<8x8xf32>
    %69 = arith.truncf %68 : vector<8x8xf32> to vector<8x8xbf16>
    %c1_43 = arith.constant 1 : index
    %c1_44 = arith.constant 1 : index
    %c0_45 = arith.constant 0 : index
    %c0_46 = arith.constant 0 : index
    %70 = vector.load %arg19[%c1_43, %c1_44, %c0_45, %c0_46] : memref<3x4x8x8xbf16, #tpu.memory_space<vmem>>, vector<1x1x8x8xbf16>
    %71 = vector.shape_cast %70 : vector<1x1x8x8xbf16> to vector<8x8xbf16>
    %72 = vector.shape_cast %69 : vector<8x8xbf16> to vector<1x1x8x8xbf16>
    tpu.vector_store %arg19[%c1_43, %c1_44, %c0_45, %c0_46], %72 {strides = array<i32>} : memref<3x4x8x8xbf16, #tpu.memory_space<vmem>>, vector<1x1x8x8xbf16>,
    %73 = vector.extract_strided_slice %47 {offsets = [0, 8], sizes = [8, 8], strides = [1, 1]} : vector<8x32xf32> to vector<8x8xf32>
    %74 = arith.truncf %73 : vector<8x8xf32> to vector<8x8xbf16>
    %c2_47 = arith.constant 2 : index
    %c1_48 = arith.constant 1 : index
    %c0_49 = arith.constant 0 : index
    %c0_50 = arith.constant 0 : index
    %75 = vector.load %arg19[%c2_47, %c1_48, %c0_49, %c0_50] : memref<3x4x8x8xbf16, #tpu.memory_space<vmem>>, vector<1x1x8x8xbf16>
    %76 = vector.shape_cast %75 : vector<1x1x8x8xbf16> to vector<8x8xbf16>
    %77 = vector.shape_cast %74 : vector<8x8xbf16> to vector<1x1x8x8xbf16>
    tpu.vector_store %arg19[%c2_47, %c1_48, %c0_49, %c0_50], %77 {strides = array<i32>} : memref<3x4x8x8xbf16, #tpu.memory_space<vmem>>, vector<1x1x8x8xbf16>,
    %78 = vector.extract_strided_slice %35 {offsets = [0, 16], sizes = [8, 8], strides = [1, 1]} : vector<8x32xf32> to vector<8x8xf32>
    %79 = arith.truncf %78 : vector<8x8xf32> to vector<8x8xbf16>
    %c0_51 = arith.constant 0 : index
    %c2_52 = arith.constant 2 : index
    %c0_53 = arith.constant 0 : index
    %c0_54 = arith.constant 0 : index
    %80 = vector.load %arg19[%c0_51, %c2_52, %c0_53, %c0_54] : memref<3x4x8x8xbf16, #tpu.memory_space<vmem>>, vector<1x1x8x8xbf16>
    %81 = vector.shape_cast %80 : vector<1x1x8x8xbf16> to vector<8x8xbf16>
    %82 = vector.shape_cast %79 : vector<8x8xbf16> to vector<1x1x8x8xbf16>
    tpu.vector_store %arg19[%c0_51, %c2_52, %c0_53, %c0_54], %82 {strides = array<i32>} : memref<3x4x8x8xbf16, #tpu.memory_space<vmem>>, vector<1x1x8x8xbf16>,
    %83 = vector.extract_strided_slice %41 {offsets = [0, 16], sizes = [8, 8], strides = [1, 1]} : vector<8x32xf32> to vector<8x8xf32>
    %84 = arith.truncf %83 : vector<8x8xf32> to vector<8x8xbf16>
    %c1_55 = arith.constant 1 : index
    %c2_56 = arith.constant 2 : index
    %c0_57 = arith.constant 0 : index
    %c0_58 = arith.constant 0 : index
    %85 = vector.load %arg19[%c1_55, %c2_56, %c0_57, %c0_58] : memref<3x4x8x8xbf16, #tpu.memory_space<vmem>>, vector<1x1x8x8xbf16>
    %86 = vector.shape_cast %85 : vector<1x1x8x8xbf16> to vector<8x8xbf16>
    %87 = vector.shape_cast %84 : vector<8x8xbf16> to vector<1x1x8x8xbf16>
    tpu.vector_store %arg19[%c1_55, %c2_56, %c0_57, %c0_58], %87 {strides = array<i32>} : memref<3x4x8x8xbf16, #tpu.memory_space<vmem>>, vector<1x1x8x8xbf16>,
    %88 = vector.extract_strided_slice %47 {offsets = [0, 16], sizes = [8, 8], strides = [1, 1]} : vector<8x32xf32> to vector<8x8xf32>
    %89 = arith.truncf %88 : vector<8x8xf32> to vector<8x8xbf16>
    %c2_59 = arith.constant 2 : index
    %c2_60 = arith.constant 2 : index
    %c0_61 = arith.constant 0 : index
    %c0_62 = arith.constant 0 : index
    %90 = vector.load %arg19[%c2_59, %c2_60, %c0_61, %c0_62] : memref<3x4x8x8xbf16, #tpu.memory_space<vmem>>, vector<1x1x8x8xbf16>
    %91 = vector.shape_cast %90 : vector<1x1x8x8xbf16> to vector<8x8xbf16>
    %92 = vector.shape_cast %89 : vector<8x8xbf16> to vector<1x1x8x8xbf16>
    tpu.vector_store %arg19[%c2_59, %c2_60, %c0_61, %c0_62], %92 {strides = array<i32>} : memref<3x4x8x8xbf16, #tpu.memory_space<vmem>>, vector<1x1x8x8xbf16>,
    %93 = vector.extract_strided_slice %35 {offsets = [0, 24], sizes = [8, 8], strides = [1, 1]} : vector<8x32xf32> to vector<8x8xf32>
    %94 = arith.truncf %93 : vector<8x8xf32> to vector<8x8xbf16>
    %c0_63 = arith.constant 0 : index
    %c3 = arith.constant 3 : index
    %c0_64 = arith.constant 0 : index
    %c0_65 = arith.constant 0 : index
    %95 = vector.load %arg19[%c0_63, %c3, %c0_64, %c0_65] : memref<3x4x8x8xbf16, #tpu.memory_space<vmem>>, vector<1x1x8x8xbf16>
    %96 = vector.shape_cast %95 : vector<1x1x8x8xbf16> to vector<8x8xbf16>
    %97 = vector.shape_cast %94 : vector<8x8xbf16> to vector<1x1x8x8xbf16>
    tpu.vector_store %arg19[%c0_63, %c3, %c0_64, %c0_65], %97 {strides = array<i32>} : memref<3x4x8x8xbf16, #tpu.memory_space<vmem>>, vector<1x1x8x8xbf16>,
    %98 = vector.extract_strided_slice %41 {offsets = [0, 24], sizes = [8, 8], strides = [1, 1]} : vector<8x32xf32> to vector<8x8xf32>
    %99 = arith.truncf %98 : vector<8x8xf32> to vector<8x8xbf16>
    %c1_66 = arith.constant 1 : index
    %c3_67 = arith.constant 3 : index
    %c0_68 = arith.constant 0 : index
    %c0_69 = arith.constant 0 : index
    %100 = vector.load %arg19[%c1_66, %c3_67, %c0_68, %c0_69] : memref<3x4x8x8xbf16, #tpu.memory_space<vmem>>, vector<1x1x8x8xbf16>
    %101 = vector.shape_cast %100 : vector<1x1x8x8xbf16> to vector<8x8xbf16>
    %102 = vector.shape_cast %99 : vector<8x8xbf16> to vector<1x1x8x8xbf16>
    tpu.vector_store %arg19[%c1_66, %c3_67, %c0_68, %c0_69], %102 {strides = array<i32>} : memref<3x4x8x8xbf16, #tpu.memory_space<vmem>>, vector<1x1x8x8xbf16>,
    %103 = vector.extract_strided_slice %47 {offsets = [0, 24], sizes = [8, 8], strides = [1, 1]} : vector<8x32xf32> to vector<8x8xf32>
    %104 = arith.truncf %103 : vector<8x8xf32> to vector<8x8xbf16>
    %c2_70 = arith.constant 2 : index
    %c3_71 = arith.constant 3 : index
    %c0_72 = arith.constant 0 : index
    %c0_73 = arith.constant 0 : index
    %105 = vector.load %arg19[%c2_70, %c3_71, %c0_72, %c0_73] : memref<3x4x8x8xbf16, #tpu.memory_space<vmem>>, vector<1x1x8x8xbf16>
    %106 = vector.shape_cast %105 : vector<1x1x8x8xbf16> to vector<8x8xbf16>
    %107 = vector.shape_cast %104 : vector<8x8xbf16> to vector<1x1x8x8xbf16>
    tpu.vector_store %arg19[%c2_70, %c3_71, %c0_72, %c0_73], %107 {strides = array<i32>} : memref<3x4x8x8xbf16, #tpu.memory_space<vmem>>, vector<1x1x8x8xbf16>,
    %c0_74 = arith.constant 0 : index
    %c0_75 = arith.constant 0 : index
    %c0_76 = arith.constant 0 : index
    %c0_77 = arith.constant 0 : index
    %108 = vector.load %arg19[%c0_74, %c0_75, %c0_76, %c0_77] : memref<3x4x8x8xbf16, #tpu.memory_space<vmem>>, vector<1x4x8x8xbf16>
    %109 = vector.shape_cast %108 : vector<1x4x8x8xbf16> to vector<4x8x8xbf16>
    %c1_78 = arith.constant 1 : index
    %c0_79 = arith.constant 0 : index
    %c0_80 = arith.constant 0 : index
    %c0_81 = arith.constant 0 : index
    %110 = vector.load %arg19[%c1_78, %c0_79, %c0_80, %c0_81] : memref<3x4x8x8xbf16, #tpu.memory_space<vmem>>, vector<1x4x8x8xbf16>
    %111 = vector.shape_cast %110 : vector<1x4x8x8xbf16> to vector<4x8x8xbf16>
    %c2_82 = arith.constant 2 : index
    %c0_83 = arith.constant 0 : index
    %c0_84 = arith.constant 0 : index
    %c0_85 = arith.constant 0 : index
    %112 = vector.load %arg19[%c2_82, %c0_83, %c0_84, %c0_85] : memref<3x4x8x8xbf16, #tpu.memory_space<vmem>>, vector<1x4x8x8xbf16>
    %113 = vector.shape_cast %112 : vector<1x4x8x8xbf16> to vector<4x8x8xbf16>
    %cst_86 = arith.constant dense<0.000000e+00> : vector<4x8x8xf32>
    %114 = tpu.matmul %109, %111, %cst_86 {dimension_numbers = #tpu.dot_dimension_numbers<[2], [2], [1], [1], [0, 0, 0, 1, 1, 1], [0], [0]>} : vector<4x8x8xbf16>, vector<4x8x8xbf16>, vector<4x8x8xf32> -> vector<4x8x8xf32>
    %cst_87 = arith.constant 1.000000e+00 : f32
    %115 = vector.broadcast %cst_87 : f32 to vector<1x8xf32>
    %116 = arith.subf %115, %3 : vector<1x8xf32>
    %cst_88 = arith.constant 1.000000e+04 : f32
    %117 = vector.broadcast %cst_88 : f32 to vector<1x8xf32>
    %118 = arith.mulf %117, %116 : vector<1x8xf32>
    %119 = vector.shape_cast %118 : vector<1x8xf32> to vector<1x1x8xf32>
    %120 = vector.broadcast %119 : vector<1x1x8xf32> to vector<4x8x8xf32>
    %121 = arith.subf %114, %120 : vector<4x8x8xf32>
    %cst_89 = arith.constant dense<0xFF800000> : vector<4x8xf32>
    %122 = vector.multi_reduction <maximumf>, %121, %cst_89 [2] : vector<4x8x8xf32> to vector<4x8xf32>
    %123 = vector.shape_cast %122 : vector<4x8xf32> to vector<4x8x1xf32>
    %124 = vector.broadcast %123 : vector<4x8x1xf32> to vector<4x8x8xf32>
    %125 = arith.subf %121, %124 : vector<4x8x8xf32>
    %126 = math.exp %125 : vector<4x8x8xf32>
    %cst_90 = arith.constant dense<0.000000e+00> : vector<4x8xf32>
    %127 = vector.multi_reduction <add>, %126, %cst_90 [2] : vector<4x8x8xf32> to vector<4x8xf32>
    %128 = vector.shape_cast %127 : vector<4x8xf32> to vector<4x8x1xf32>
    %129 = tpu.reciprocal %128 {approx = true} : vector<4x8x1xf32> -> vector<4x8x1xf32>
    %130 = arith.mulf %128, %129 : vector<4x8x1xf32>
    %cst_91 = arith.constant 2.000000e+00 : f32
    %131 = vector.broadcast %cst_91 : f32 to vector<4x8x1xf32>
    %132 = arith.subf %131, %130 : vector<4x8x1xf32>
    %133 = arith.mulf %129, %132 : vector<4x8x1xf32>
    %134 = vector.broadcast %133 : vector<4x8x1xf32> to vector<4x8x8xf32>
    %135 = arith.mulf %126, %134 : vector<4x8x8xf32>
    %c0_92 = arith.constant 0 : index
    %c0_93 = arith.constant 0 : index
    %c0_94 = arith.constant 0 : index
    %c0_95 = arith.constant 0 : index
    %136 = vector.load %arg18[%c0_92, %c0_93, %c0_94, %c0_95] : memref<1x4x8x8xf32, #tpu.memory_space<vmem>>, vector<1x4x8x8xf32>
    %137 = vector.shape_cast %136 : vector<1x4x8x8xf32> to vector<4x8x8xf32>
    %138 = vector.shape_cast %135 : vector<4x8x8xf32> to vector<1x4x8x8xf32>
    tpu.vector_store %arg18[%c0_92, %c0_93, %c0_94, %c0_95], %138 {strides = array<i32>} : memref<1x4x8x8xf32, #tpu.memory_space<vmem>>, vector<1x4x8x8xf32>,
    %139 = arith.truncf %135 : vector<4x8x8xf32> to vector<4x8x8xbf16>
    %cst_96 = arith.constant dense<0.000000e+00> : vector<4x8x8xf32>
    %140 = tpu.matmul %139, %113, %cst_96 {dimension_numbers = #tpu.dot_dimension_numbers<[2], [1], [1], [2], [0, 0, 0, 1, 1, 2], [0], [0]>} : vector<4x8x8xbf16>, vector<4x8x8xbf16>, vector<4x8x8xf32> -> vector<4x8x8xf32>
    %141 = vector.extract_strided_slice %140 {offsets = [0, 0, 0], sizes = [1, 8, 8], strides = [1, 1, 1]} : vector<4x8x8xf32> to vector<1x8x8xf32>
    %142 = vector.shape_cast %141 : vector<1x8x8xf32> to vector<8x8xf32>
    %143 = arith.truncf %142 : vector<8x8xf32> to vector<8x8xbf16>
    %c0_97 = arith.constant 0 : index
    %c0_98 = arith.constant 0 : index
    %144 = vector.load %arg20[%c0_97, %c0_98] : memref<8x32xbf16, #tpu.memory_space<vmem>>, vector<8x8xbf16>
    tpu.vector_store %arg20[%c0_97, %c0_98], %143 {strides = array<i32>} : memref<8x32xbf16, #tpu.memory_space<vmem>>, vector<8x8xbf16>,
    %145 = vector.extract_strided_slice %140 {offsets = [1, 0, 0], sizes = [1, 8, 8], strides = [1, 1, 1]} : vector<4x8x8xf32> to vector<1x8x8xf32>
    %146 = vector.shape_cast %145 : vector<1x8x8xf32> to vector<8x8xf32>
    %147 = arith.truncf %146 : vector<8x8xf32> to vector<8x8xbf16>
    %c0_99 = arith.constant 0 : index
    %c8 = arith.constant 8 : index
    %148 = vector.load %arg20[%c0_99, %c8] : memref<8x32xbf16, #tpu.memory_space<vmem>>, vector<8x8xbf16>
    tpu.vector_store %arg20[%c0_99, %c8], %147 {strides = array<i32>} : memref<8x32xbf16, #tpu.memory_space<vmem>>, vector<8x8xbf16>,
    %149 = vector.extract_strided_slice %140 {offsets = [2, 0, 0], sizes = [1, 8, 8], strides = [1, 1, 1]} : vector<4x8x8xf32> to vector<1x8x8xf32>
    %150 = vector.shape_cast %149 : vector<1x8x8xf32> to vector<8x8xf32>
    %151 = arith.truncf %150 : vector<8x8xf32> to vector<8x8xbf16>
    %c0_100 = arith.constant 0 : index
    %c16 = arith.constant 16 : index
    %152 = vector.load %arg20[%c0_100, %c16] : memref<8x32xbf16, #tpu.memory_space<vmem>>, vector<8x8xbf16>
    tpu.vector_store %arg20[%c0_100, %c16], %151 {strides = array<i32>} : memref<8x32xbf16, #tpu.memory_space<vmem>>, vector<8x8xbf16>,
    %153 = vector.extract_strided_slice %140 {offsets = [3, 0, 0], sizes = [1, 8, 8], strides = [1, 1, 1]} : vector<4x8x8xf32> to vector<1x8x8xf32>
    %154 = vector.shape_cast %153 : vector<1x8x8xf32> to vector<8x8xf32>
    %155 = arith.truncf %154 : vector<8x8xf32> to vector<8x8xbf16>
    %c0_101 = arith.constant 0 : index
    %c24 = arith.constant 24 : index
    %156 = vector.load %arg20[%c0_101, %c24] : memref<8x32xbf16, #tpu.memory_space<vmem>>, vector<8x8xbf16>
    tpu.vector_store %arg20[%c0_101, %c24], %155 {strides = array<i32>} : memref<8x32xbf16, #tpu.memory_space<vmem>>, vector<8x8xbf16>,
    %c0_102 = arith.constant 0 : index
    %c0_103 = arith.constant 0 : index
    %157 = vector.load %arg20[%c0_102, %c0_103] : memref<8x32xbf16, #tpu.memory_space<vmem>>, vector<8x32xbf16>
    %c0_104 = arith.constant 0 : index
    %c0_105 = arith.constant 0 : index
    %158 = vector.load %arg11[%c0_104, %c0_105] : memref<32x32xbf16, #tpu.memory_space<vmem>>, vector<32x32xbf16>
    %cst_106 = arith.constant dense<0.000000e+00> : vector<8x32xf32>
    %159 = tpu.matmul %157, %158, %cst_106 {dimension_numbers = #tpu.dot_dimension_numbers<[1], [0], [0], [1], [0, 0, 1, 1], [], []>} : vector<8x32xbf16>, vector<32x32xbf16>, vector<8x32xf32> -> vector<8x32xf32>
    %c0_107 = arith.constant 0 : index
    %c0_108 = arith.constant 0 : index
    %160 = vector.load %arg12[%c0_107, %c0_108] : memref<1x32xf32, #tpu.memory_space<vmem>>, vector<1x32xf32>
    %161 = vector.broadcast %160 : vector<1x32xf32> to vector<8x32xf32>
    %162 = arith.addf %159, %161 : vector<8x32xf32>
    %163 = arith.addf %1, %162 : vector<8x32xf32>
    %cst_109 = arith.constant dense<0.000000e+00> : vector<8xf32>
    %164 = vector.multi_reduction <add>, %163, %cst_109 [1] : vector<8x32xf32> to vector<8xf32>
    %165 = vector.shape_cast %164 : vector<8xf32> to vector<8x1xf32>
    %cst_110 = arith.constant 3.200000e+01 : f32
    %166 = vector.broadcast %cst_110 : f32 to vector<8x1xf32>
    %167 = arith.divf %165, %166 : vector<8x1xf32>
    %168 = vector.broadcast %167 : vector<8x1xf32> to vector<8x32xf32>
    %169 = arith.subf %163, %168 : vector<8x32xf32>
    %170 = arith.mulf %169, %169 : vector<8x32xf32>
    %cst_111 = arith.constant dense<0.000000e+00> : vector<8xf32>
    %171 = vector.multi_reduction <add>, %170, %cst_111 [1] : vector<8x32xf32> to vector<8xf32>
    %172 = vector.shape_cast %171 : vector<8xf32> to vector<8x1xf32>
    %cst_112 = arith.constant 3.200000e+01 : f32
    %173 = vector.broadcast %cst_112 : f32 to vector<8x1xf32>
    %174 = arith.divf %172, %173 : vector<8x1xf32>
    %175 = vector.broadcast %167 : vector<8x1xf32> to vector<8x32xf32>
    %176 = arith.subf %163, %175 : vector<8x32xf32>
    %cst_113 = arith.constant 9.99999996E-13 : f32
    %177 = vector.broadcast %cst_113 : f32 to vector<8x1xf32>
    %178 = arith.addf %174, %177 : vector<8x1xf32>
    %179 = math.rsqrt %178 : vector<8x1xf32>
    %180 = vector.broadcast %179 : vector<8x1xf32> to vector<8x32xf32>
    %181 = arith.mulf %176, %180 : vector<8x32xf32>
    %182 = vector.broadcast %4 : vector<1x32xf32> to vector<8x32xf32>
    %183 = arith.mulf %181, %182 : vector<8x32xf32>
    %184 = vector.broadcast %5 : vector<1x32xf32> to vector<8x32xf32>
    %185 = arith.addf %183, %184 : vector<8x32xf32>
    %186 = arith.truncf %185 : vector<8x32xf32> to vector<8x32xbf16>
    %c0_114 = arith.constant 0 : index
    %c0_115 = arith.constant 0 : index
    %187 = vector.load %arg13[%c0_114, %c0_115] : memref<32x128xbf16, #tpu.memory_space<vmem>>, vector<32x128xbf16>
    %cst_116 = arith.constant dense<0.000000e+00> : vector<8x128xf32>
    %188 = tpu.matmul %186, %187, %cst_116 {dimension_numbers = #tpu.dot_dimension_numbers<[1], [0], [0], [1], [0, 0, 1, 1], [], []>} : vector<8x32xbf16>, vector<32x128xbf16>, vector<8x128xf32> -> vector<8x128xf32>
    %c0_117 = arith.constant 0 : index
    %c0_118 = arith.constant 0 : index
    %189 = vector.load %arg14[%c0_117, %c0_118] : memref<1x128xf32, #tpu.memory_space<vmem>>, vector<1x128xf32>
    %190 = vector.broadcast %189 : vector<1x128xf32> to vector<8x128xf32>
    %191 = arith.addf %188, %190 : vector<8x128xf32>
    %cst_119 = arith.constant 5.000000e-01 : f32
    %192 = vector.broadcast %cst_119 : f32 to vector<8x128xf32>
    %193 = arith.mulf %191, %192 : vector<8x128xf32>
    %cst_120 = arith.constant 0.707106769 : f32
    %194 = vector.broadcast %cst_120 : f32 to vector<8x128xf32>
    %195 = arith.mulf %191, %194 : vector<8x128xf32>
    %196 = math.erf %195 : vector<8x128xf32>
    %cst_121 = arith.constant 1.000000e+00 : f32
    %197 = vector.broadcast %cst_121 : f32 to vector<8x128xf32>
    %198 = arith.addf %197, %196 : vector<8x128xf32>
    %199 = arith.mulf %193, %198 : vector<8x128xf32>
    %200 = arith.truncf %199 : vector<8x128xf32> to vector<8x128xbf16>
    %c0_122 = arith.constant 0 : index
    %c0_123 = arith.constant 0 : index
    %201 = vector.load %arg15[%c0_122, %c0_123] : memref<128x32xbf16, #tpu.memory_space<vmem>>, vector<128x32xbf16>
    %cst_124 = arith.constant dense<0.000000e+00> : vector<8x32xf32>
    %202 = tpu.matmul %200, %201, %cst_124 {dimension_numbers = #tpu.dot_dimension_numbers<[1], [0], [0], [1], [0, 0, 1, 1], [], []>} : vector<8x128xbf16>, vector<128x32xbf16>, vector<8x32xf32> -> vector<8x32xf32>
    %c0_125 = arith.constant 0 : index
    %c0_126 = arith.constant 0 : index
    %203 = vector.load %arg16[%c0_125, %c0_126] : memref<1x32xf32, #tpu.memory_space<vmem>>, vector<1x32xf32>
    %204 = vector.broadcast %203 : vector<1x32xf32> to vector<8x32xf32>
    %205 = arith.addf %202, %204 : vector<8x32xf32>
    %206 = arith.addf %163, %205 : vector<8x32xf32>
    %c0_127 = arith.constant 0 : index
    %c0_128 = arith.constant 0 : index
    %c0_129 = arith.constant 0 : index
    %207 = vector.load %arg17[%c0_127, %c0_128, %c0_129] : memref<1x8x32xf32, #tpu.memory_space<vmem>>, vector<1x8x32xf32>
    %208 = vector.shape_cast %207 : vector<1x8x32xf32> to vector<8x32xf32>
    %209 = vector.shape_cast %206 : vector<8x32xf32> to vector<1x8x32xf32>
    tpu.vector_store %arg17[%c0_127, %c0_128, %c0_129], %209 {strides = array<i32>} : memref<1x8x32xf32, #tpu.memory_space<vmem>>, vector<1x8x32xf32>,
    return
  }
  func.func @transform_0(%arg0: i32) -> (i32, i32, i32) {
    %c0_i32 = arith.constant 0 : i32
    %c0_i32_0 = arith.constant 0 : i32
    %c0_i32_1 = arith.constant 0 : i32
    return %arg0, %c0_i32, %c0_i32_0 : i32, i32, i32
  }
  func.func @transform_1(%arg0: i32) -> (i32, i32, i32) {
    %c0_i32 = arith.constant 0 : i32
    %c0_i32_0 = arith.constant 0 : i32
    %c0_i32_1 = arith.constant 0 : i32
    return %arg0, %c0_i32, %c0_i32_0 : i32, i32, i32
  }
  func.func @transform_2(%arg0: i32) -> (i32, i32) {
    %c0_i32 = arith.constant 0 : i32
    %c0_i32_0 = arith.constant 0 : i32
    %c0_i32_1 = arith.constant 0 : i32
    return %c0_i32, %c0_i32_0 : i32, i32
  }
  func.func @transform_3(%arg0: i32) -> (i32, i32) {
    %c0_i32 = arith.constant 0 : i32
    %c0_i32_0 = arith.constant 0 : i32
    %c0_i32_1 = arith.constant 0 : i32
    return %c0_i32, %c0_i32_0 : i32, i32
  }
  func.func @transform_4(%arg0: i32) -> (i32, i32) {
    %c0_i32 = arith.constant 0 : i32
    %c0_i32_0 = arith.constant 0 : i32
    %c0_i32_1 = arith.constant 0 : i32
    return %c0_i32, %c0_i32_0 : i32, i32
  }
  func.func @transform_5(%arg0: i32) -> (i32, i32) {
    %c0_i32 = arith.constant 0 : i32
    %c0_i32_0 = arith.constant 0 : i32
    %c0_i32_1 = arith.constant 0 : i32
    return %c0_i32, %c0_i32_0 : i32, i32
  }
  func.func @transform_6(%arg0: i32) -> (i32, i32) {
    %c0_i32 = arith.constant 0 : i32
    %c0_i32_0 = arith.constant 0 : i32
    %c0_i32_1 = arith.constant 0 : i32
    return %c0_i32, %c0_i32_0 : i32, i32
  }
  func.func @transform_7(%arg0: i32) -> (i32, i32) {
    %c0_i32 = arith.constant 0 : i32
    %c0_i32_0 = arith.constant 0 : i32
    %c0_i32_1 = arith.constant 0 : i32
    return %c0_i32, %c0_i32_0 : i32, i32
  }
  func.func @transform_8(%arg0: i32) -> (i32, i32) {
    %c0_i32 = arith.constant 0 : i32
    %c0_i32_0 = arith.constant 0 : i32
    %c0_i32_1 = arith.constant 0 : i32
    return %c0_i32, %c0_i32_0 : i32, i32
  }
  func.func @transform_9(%arg0: i32) -> (i32, i32) {
    %c0_i32 = arith.constant 0 : i32
    %c0_i32_0 = arith.constant 0 : i32
    %c0_i32_1 = arith.constant 0 : i32
    return %c0_i32, %c0_i32_0 : i32, i32
  }
  func.func @transform_10(%arg0: i32) -> (i32, i32) {
    %c0_i32 = arith.constant 0 : i32
    %c0_i32_0 = arith.constant 0 : i32
    %c0_i32_1 = arith.constant 0 : i32
    return %c0_i32, %c0_i32_0 : i32, i32
  }
  func.func @transform_11(%arg0: i32) -> (i32, i32) {
    %c0_i32 = arith.constant 0 : i32
    %c0_i32_0 = arith.constant 0 : i32
    %c0_i32_1 = arith.constant 0 : i32
    return %c0_i32, %c0_i32_0 : i32, i32
  }
  func.func @transform_12(%arg0: i32) -> (i32, i32) {
    %c0_i32 = arith.constant 0 : i32
    %c0_i32_0 = arith.constant 0 : i32
    %c0_i32_1 = arith.constant 0 : i32
    return %c0_i32, %c0_i32_0 : i32, i32
  }
  func.func @transform_13(%arg0: i32) -> (i32, i32) {
    %c0_i32 = arith.constant 0 : i32
    %c0_i32_0 = arith.constant 0 : i32
    %c0_i32_1 = arith.constant 0 : i32
    return %c0_i32, %c0_i32_0 : i32, i32
  }
  func.func @transform_14(%arg0: i32) -> (i32, i32) {
    %c0_i32 = arith.constant 0 : i32
    %c0_i32_0 = arith.constant 0 : i32
    %c0_i32_1 = arith.constant 0 : i32
    return %c0_i32, %c0_i32_0 : i32, i32
  }
  func.func @transform_15(%arg0: i32) -> (i32, i32) {
    %c0_i32 = arith.constant 0 : i32
    %c0_i32_0 = arith.constant 0 : i32
    %c0_i32_1 = arith.constant 0 : i32
    return %c0_i32, %c0_i32_0 : i32, i32
  }
  func.func @transform_16(%arg0: i32) -> (i32, i32, i32) {
    %c0_i32 = arith.constant 0 : i32
    %c0_i32_0 = arith.constant 0 : i32
    %c0_i32_1 = arith.constant 0 : i32
    return %arg0, %c0_i32, %c0_i32_0 : i32, i32, i32
  }
  func.func @transform_17(%arg0: i32) -> (i32, i32, i32, i32) {
    %c0_i32 = arith.constant 0 : i32
    %c0_i32_0 = arith.constant 0 : i32
    %c0_i32_1 = arith.constant 0 : i32
    %c0_i32_2 = arith.constant 0 : i32
    return %arg0, %c0_i32, %c0_i32_0, %c0_i32_1 : i32, i32, i32, i32
  }
}

</mosaic_0001>

<bundles_post_ra>
// kernel: tpu_custom_call.1
= control target key start
LH: loop header
LB: loop body
LE: loop exit
PB: predicated region body
PF: predicated region fallthrough
CT: control target
= control target key end

     0   :  { %s4088_s0 = inlined_call_operand.hbm [shape: f32[2,8,32], index: 0, kind: input, shape index: {}]   ;;  %s4089_s1 = inlined_call_operand.hbm [shape: f32[2,1,8], index: 1, kind: input, shape index: {}]   ;;  %s4090_s2 = inlined_call_operand.hbm [shape: f32[1,32], index: 2, kind: input, shape index: {}]   ;;  %s4091_s3 = inlined_call_operand.hbm [shape: f32[1,32], index: 3, kind: input, shape index: {}]   ;;  %s4092_s4 = inlined_call_operand.hbm [shape: bf16[32,32], index: 4, kind: input, shape index: {}]   ;;  %s4093_s5 = inlined_call_operand.hbm [shape: f32[1,32], index: 5, kind: input, shape index: {}]   ;;  %s4094_s6 = inlined_call_operand.hbm [shape: bf16[32,32], index: 6, kind: input, shape index: {}]   ;;  %s4095_s7 = inlined_call_operand.hbm [shape: f32[1,32], index: 7, kind: input, shape index: {}]   ;;  %s4096_s8 = inlined_call_operand.hbm [shape: bf16[32,32], index: 8, kind: input, shape index: {}]   ;;  %s4097_s9 = inlined_call_operand.hbm [shape: f32[1,32], index: 9, kind: input, shape index: {}]   ;;  %s4098_s10 = inlined_call_operand.hbm [shape: bf16[32,32], index: 10, kind: input, shape index: {}]   ;;  %s4099_s11 = inlined_call_operand.hbm [shape: f32[1,32], index: 11, kind: input, shape index: {}]   ;;  %s4100_s12 = inlined_call_operand.hbm [shape: bf16[32,128], index: 12, kind: input, shape index: {}]   ;;  %s4101_s13 = inlined_call_operand.hbm [shape: f32[1,128], index: 13, kind: input, shape index: {}]   ;;  %s4102_s14 = inlined_call_operand.hbm [shape: bf16[128,32], index: 14, kind: input, shape index: {}]   ;;  %s4103_s15 = inlined_call_operand.hbm [shape: f32[1,32], index: 15, kind: input, shape index: {}]   ;;  %s4104_s16 = inlined_call_operand.hbm [shape: f32[2,8,32], index: 16, kind: output, shape index: {0}]   ;;  %s4105_s17 = inlined_call_operand.hbm [shape: f32[2,4,8,8], index: 17, kind: output, shape index: {1}]  }
   0x1   :  { %4121 = sst [smem:[#allocation49_spill]] %s4088_s0 }
   0x2   :  { %4122 = sst [smem:[#allocation50_spill]] %s4089_s1 }
   0x3   :  { %4123 = sst [smem:[#allocation51_spill]] %s4090_s2 }
   0x4   :  { %4124 = sst [smem:[#allocation52_spill]] %s4091_s3 }
   0x5   :  { %4125 = sst [smem:[#allocation53_spill]] %s4092_s4 }
   0x6   :  { %4126 = sst [smem:[#allocation54_spill]] %s4093_s5 }
   0x7   :  { %4127 = sst [smem:[#allocation55_spill]] %s4094_s6 }
   0x8   :  { %4128 = sst [smem:[#allocation56_spill]] %s4095_s7 }
   0x9   :  { %4129 = sst [smem:[#allocation57_spill]] %s4104_s16 }
   0xa   :  { %4130 = sst [smem:[#allocation58_spill]] %s4105_s17 }
   0xb   :  { %23 = vsyncpa [#allocation5], 0 }
   0xc   :  { %25 = vsyncpa [#allocation5 + $0x1], 0 }
   0xd   :  { %26 = vsyncpa [#allocation8], 0 }
   0xe   :  { %28 = vsyncpa [#allocation8 + $0x1], 0 }
   0xf   :  { %29 = vsyncpa [#allocation11], 0 }
  0x10   :  { %30 = vsyncpa [#allocation14], 0 }
  0x11   :  { %31 = vsyncpa [#allocation17], 0 }
  0x12   :  { %32 = vsyncpa [#allocation20], 0 }
  0x13   :  { %33 = vsyncpa [#allocation23], 0 }
  0x14   :  { %34 = vsyncpa [#allocation26], 0 }
  0x15   :  { %35 = vsyncpa [#allocation29], 0 }
  0x16   :  { %36 = vsyncpa [#allocation6], 0 }
  0x17   :  { %38 = vsyncpa [#allocation6 + $0x1], 0 }
  0x18   :  { %39 = vsyncpa [#allocation32], 0 }
  0x19   :  { %41 = vsyncpa [#allocation32 + $0x1], 0  ;;  %s3333_s24 = smov 0   ;;  %s3335_s25 = smov 0  }
  0x1a   :  { %s3337_s26 = smov 0   ;;  %s3339_s27 = smov 0  }
  0x1b LB: > { %4131 = sst [smem:[#allocation45_spill]] %s3200_s24  ;;  %s3214_s28 = smov [#allocation9]   ;;  %s3212_s27 = sphi %s3339_s27, %s4187_s27   ;;  %s3208_s26 = sphi %s3337_s26, %s4186_s26   ;;  %s3204_s25 = sphi %s3335_s25, %s4185_s25   ;;  %s3200_s24 = sphi %s3333_s24, %s4184_s24  }
  0x1c   : > { %4132 = sst [smem:[#allocation46_spill]] %s3204_s25  ;;  %s463_s29 = sshll.u32 %s3214_s28, 4  ;;  %s3359_s29 = int_to_ptr.vmem [resolvable:$true] %s463_s29 }
  0x1d   : > { %s3354_s0 = sadd.s32 4294967295, %s3212_s27   ;;  %p2134_p0 = scmp.ge.s32.totalorder %s3212_s27, 1 }
  0x1e   : > { %4133 = sst [smem:[#allocation47_spill]] %s3354_s0  ;;  %p4115_p1 = scmp.eq.s32.totalorder %s3354_s0, 0 }
  0x1f   : > { %p450_p2 = scmp.lt.s32.totalorder %s3212_s27, 3  ;;  %s3215_s18 = smov [#allocation10]  }
  0x20   : > { %s474_s19 = sshll.u32 %s3215_s18, 4  ;;  %s3216_s1 = smov [#allocation13]   ;;  %s3368_s19 = int_to_ptr.vmem [resolvable:$true] %s474_s19 }
  0x21   : > { %p3361_p3 = pnand %p2134_p0, %p450_p2  ;;  %s498_s20 = sshll.u32 %s3216_s1, 4  ;;  %s3376_s20 = int_to_ptr.vmem [resolvable:$true] %s498_s20 }
  0x22   : > { %s3217_s22 = smov [#allocation16]   ;;  %s4137_s2 = sld [smem:[#allocation51_spill]] }
  0x23   : > { %s4134_s30 = scalar_select %p3361_p3, 1, 0 }
  0x24   : > { %p2442_p5 = pneg %p3361_p3  ;;  %s3378_s23 = sshll.u32 %s3217_s22, 4  ;;  %s523_s23 = int_to_ptr.vmem [resolvable:$true] %s3378_s23 }
  0x25   : > { %4135 = sst [smem:[#allocation48_spill]] %s4134_s30 }
  0x26   : > { %p3372_p6 = pnand %p2442_p5, %p4115_p1 }
  0x28   : > { %s2626_s17 = scalar_lea.hbm %s4137_s2, 16  ;;  %p3388_p8 = pneg %p3372_p6 }
  0x29   : > { %p2627_p7 = scmp.ne.s32.totalorder %s4137_s2, %s2626_s17  ;;  %p2633_p11 = scmp.lt.u32.totalorder %s2626_s17, %s4137_s2 }
  0x2b   : > { %p2629_p9 = pnand %p3388_p8, %p2627_p7 }
  0x2d   : > { %p2630_p10 = pneg %p2629_p9 }
  0x2f   : > { %p2635_p12 = pnand %p2633_p11, %p2630_p10 }
  0x31   : > { %2638 = shalt.err (!%p2635_p12)
}
  0x32   : > { %s2639_s16 = scalar_lea.vmem %s3359_s29, 16  ;;  %s2646_s30 = scalar_lea.vmem %s3359_s29, 32 }
  0x33   : > { %p2640_p13 = scmp.ne.s32.totalorder %s3359_s29, %s2639_s16  ;;  %p2647_p5 = scmp.lt.s32.totalorder %s3359_s29, %s3359_s29 }
  0x34   : > { %p2648_p7 = scmp.lt.s32.totalorder %s2646_s30, %s2639_s16 }
  0x35   : > { %p2642_p0 = pnand %p2640_p13, %p3388_p8 }
  0x36   : > { %p2649_p9 = por %p2648_p7, %p2647_p5 }
  0x37   : > { %p2643_p2 = pneg %p2642_p0 }
  0x39   : > { %p2650_p4 = pnand %p2649_p9, %p2643_p2 }
  0x3b   : > { %2653 = shalt.err (!%p2650_p4)
}
  0x3c   : > { %2445 = dma.hbm_to_vmem [thread:$0]  (!%p3372_p6), %s4137_s2, 16, %s3359_s29, [#allocation8]  }
  0x3d   : > { %s4139_s3 = sld [smem:[#allocation52_spill]] }
  0x43   : > { %s2654_s22 = scalar_lea.hbm %s4139_s3, 16 }
  0x44   : > { %p2655_p10 = scmp.ne.s32.totalorder %s4139_s3, %s2654_s22  ;;  %p2661_p4 = scmp.lt.u32.totalorder %s2654_s22, %s4139_s3 }
  0x46   : > { %p2657_p11 = pnand %p2655_p10, %p3388_p8 }
  0x48   : > { %p2658_p12 = pneg %p2657_p11 }
  0x4a   : > { %p2663_p13 = pnand %p2661_p4, %p2658_p12 }
  0x4c   : > { %2666 = shalt.err (!%p2663_p13)
}
  0x4d   : > { %s2667_s29 = scalar_lea.vmem %s3368_s19, 16  ;;  %s2674_s24 = scalar_lea.vmem %s3368_s19, 32 }
  0x4e   : > { %p2668_p0 = scmp.ne.s32.totalorder %s3368_s19, %s2667_s29  ;;  %p2675_p7 = scmp.lt.s32.totalorder %s3368_s19, %s3368_s19 }
  0x4f   : > { %p2676_p9 = scmp.lt.s32.totalorder %s2674_s24, %s2667_s29 }
  0x50   : > { %p2670_p2 = pnand %p2668_p0, %p3388_p8 }
  0x51   : > { %p2677_p10 = por %p2676_p9, %p2675_p7 }
  0x52   : > { %p2671_p5 = pneg %p2670_p2 }
  0x54   : > { %p2678_p11 = pnand %p2677_p10, %p2671_p5 }
  0x56   : > { %2681 = shalt.err (!%p2678_p11)
}
  0x57   : > { %2448 = dma.hbm_to_vmem [thread:$0]  (!%p3372_p6), %s4139_s3, 16, %s3368_s19, [#allocation11]  }
  0x58   : > { %s4140_s5 = sld [smem:[#allocation54_spill]] }
  0x5e   : > { %s2682_s18 = scalar_lea.hbm %s4140_s5, 16 }
  0x5f   : > { %p2683_p12 = scmp.ne.s32.totalorder %s4140_s5, %s2682_s18  ;;  %p2689_p0 = scmp.lt.u32.totalorder %s2682_s18, %s4140_s5 }
  0x61   : > { %p2685_p4 = pnand %p2683_p12, %p3388_p8 }
  0x63   : > { %p2686_p13 = pneg %p2685_p4 }
  0x65   : > { %p2691_p2 = pnand %p2689_p0, %p2686_p13 }
  0x67   : > { %2694 = shalt.err (!%p2691_p2)
}
  0x68   : > { %s2695_s19 = scalar_lea.vmem %s3376_s20, 16  ;;  %s2702_s24 = scalar_lea.vmem %s3376_s20, 32 }
  0x69   : > { %p2696_p5 = scmp.ne.s32.totalorder %s3376_s20, %s2695_s19  ;;  %p2703_p10 = scmp.lt.s32.totalorder %s3376_s20, %s3376_s20 }
  0x6a   : > { %p2704_p11 = scmp.lt.s32.totalorder %s2702_s24, %s2695_s19 }
  0x6b   : > { %p2698_p7 = pnand %p2696_p5, %p3388_p8 }
  0x6c   : > { %p2705_p12 = por %p2704_p11, %p2703_p10 }
  0x6d   : > { %p2699_p9 = pneg %p2698_p7 }
  0x6f   : > { %p2706_p4 = pnand %p2705_p12, %p2699_p9 }
  0x71   : > { %2709 = shalt.err (!%p2706_p4)
}
  0x72   : > { %2454 = dma.hbm_to_vmem [thread:$0]  (!%p3372_p6), %s4140_s5, 16, %s3376_s20, [#allocation14]  }
  0x73   : > { %s3218_s0 = smov [#allocation19]   ;;  %s4141_s7 = sld [smem:[#allocation56_spill]] }
  0x74   : > { %s546_s28 = sshll.u32 %s3218_s0, 4  ;;  %s547_s28 = int_to_ptr.vmem [resolvable:$true] %s546_s28 }
  0x79   : > { %s2710_s16 = scalar_lea.hbm %s4141_s7, 16 }
  0x7a   : > { %p2711_p13 = scmp.ne.s32.totalorder %s4141_s7, %s2710_s16  ;;  %p2717_p5 = scmp.lt.u32.totalorder %s2710_s16, %s4141_s7 }
  0x7c   : > { %p2713_p0 = pnand %p2711_p13, %p3388_p8 }
  0x7e   : > { %p2714_p2 = pneg %p2713_p0 }
  0x80   : > { %p2719_p7 = pnand %p2717_p5, %p2714_p2 }
  0x82   : > { %2722 = shalt.err (!%p2719_p7)
}
  0x83   : > { %s2723_s20 = scalar_lea.vmem %s523_s23, 16  ;;  %s2730_s25 = scalar_lea.vmem %s523_s23, 32 }
  0x84   : > { %p2724_p9 = scmp.ne.s32.totalorder %s523_s23, %s2723_s20  ;;  %p2731_p12 = scmp.lt.s32.totalorder %s523_s23, %s523_s23 }
  0x85   : > { %p2732_p4 = scmp.lt.s32.totalorder %s2730_s25, %s2723_s20 }
  0x86   : > { %p2726_p10 = pnand %p2724_p9, %p3388_p8 }
  0x87   : > { %p2733_p1 = por %p2732_p4, %p2731_p12 }
  0x88   : > { %p2727_p11 = pneg %p2726_p10 }
  0x8a   : > { %p2734_p3 = pnand %p2733_p1, %p2727_p11 }
  0x8c   : > { %2737 = shalt.err (!%p2734_p3)
}
  0x8d   : > { %2460 = dma.hbm_to_vmem [thread:$0]  (!%p3372_p6), %s4141_s7, 16, %s523_s23, [#allocation17]  }
  0x8e   : > { %s2738_s16 = scalar_lea.hbm %s4097_s9, 16 }
  0x8f   : > { %p2739_p13 = scmp.ne.s32.totalorder %s4097_s9, %s2738_s16  ;;  %p2745_p3 = scmp.lt.u32.totalorder %s2738_s16, %s4097_s9 }
  0x91   : > { %p2741_p0 = pnand %p2739_p13, %p3388_p8 }
  0x93   : > { %p2742_p1 = pneg %p2741_p0 }
  0x95   : > { %p2747_p2 = pnand %p2745_p3, %p2742_p1 }
  0x97   : > { %2750 = shalt.err (!%p2747_p2)
}
  0x98   : > { %s2751_s20 = scalar_lea.vmem %s547_s28, 16  ;;  %s2758_s23 = scalar_lea.vmem %s547_s28, 32 }
  0x99   : > { %p2752_p5 = scmp.ne.s32.totalorder %s547_s28, %s2751_s20  ;;  %p2759_p10 = scmp.lt.s32.totalorder %s547_s28, %s547_s28 }
  0x9a   : > { %p2760_p11 = scmp.lt.s32.totalorder %s2758_s23, %s2751_s20 }
  0x9b   : > { %p2754_p7 = pnand %p2752_p5, %p3388_p8 }
  0x9c   : > { %p2761_p12 = por %p2760_p11, %p2759_p10 }
  0x9d   : > { %p2755_p9 = pneg %p2754_p7 }
  0x9f   : > { %p2762_p4 = pnand %p2761_p12, %p2755_p9 }
  0xa1   : > { %2765 = shalt.err (!%p2762_p4)
}
  0xa2   : > { %2466 = dma.hbm_to_vmem [thread:$0]  (!%p3372_p6), %s4097_s9, 16, %s547_s28, [#allocation20]  }
  0xa3   : > { %s3219_s0 = smov [#allocation22]   ;;  %s3220_s22 = smov [#allocation25]  }
  0xa4   : > { %s570_s18 = sshll.u32 %s3219_s0, 4  ;;  %s594_s16 = sshll.u32 %s3220_s22, 4  ;;  %s571_s18 = int_to_ptr.vmem [resolvable:$true] %s570_s18  ;;  %s595_s16 = int_to_ptr.vmem [resolvable:$true] %s594_s16 }
  0xa5   : > { %s2766_s19 = scalar_lea.hbm %s4099_s11, 16 }
  0xa6   : > { %p2767_p13 = scmp.ne.s32.totalorder %s4099_s11, %s2766_s19  ;;  %p2773_p3 = scmp.lt.u32.totalorder %s2766_s19, %s4099_s11 }
  0xa8   : > { %p2769_p0 = pnand %p2767_p13, %p3388_p8 }
  0xaa   : > { %p2770_p1 = pneg %p2769_p0 }
  0xac   : > { %p2775_p2 = pnand %p2773_p3, %p2770_p1 }
  0xae   : > { %2778 = shalt.err (!%p2775_p2)
}
  0xaf   : > { %s2779_s28 = scalar_lea.vmem %s571_s18, 16  ;;  %s2786_s17 = scalar_lea.vmem %s571_s18, 32 }
  0xb0   : > { %p2780_p5 = scmp.ne.s32.totalorder %s571_s18, %s2779_s28  ;;  %p2787_p10 = scmp.lt.s32.totalorder %s571_s18, %s571_s18 }
  0xb1   : > { %p2788_p11 = scmp.lt.s32.totalorder %s2786_s17, %s2779_s28 }
  0xb2   : > { %p2782_p7 = pnand %p2780_p5, %p3388_p8 }
  0xb3   : > { %p2789_p12 = por %p2788_p11, %p2787_p10 }
  0xb4   : > { %p2783_p9 = pneg %p2782_p7 }
  0xb6   : > { %p2790_p4 = pnand %p2789_p12, %p2783_p9 }
  0xb8   : > { %2793 = shalt.err (!%p2790_p4)
}
  0xb9   : > { %2472 = dma.hbm_to_vmem [thread:$0]  (!%p3372_p6), %s4099_s11, 16, %s571_s18, [#allocation23]  }
  0xba   : > { %s2794_s19 = scalar_lea.hbm %s4101_s13, 16 }
  0xbb   : > { %p2795_p13 = scmp.ne.s32.totalorder %s4101_s13, %s2794_s19  ;;  %p2801_p3 = scmp.lt.u32.totalorder %s2794_s19, %s4101_s13 }
  0xbd   : > { %p2797_p0 = pnand %p2795_p13, %p3388_p8 }
  0xbf   : > { %p2798_p1 = pneg %p2797_p0 }
  0xc1   : > { %p2803_p2 = pnand %p2801_p3, %p2798_p1 }
  0xc3   : > { %2806 = shalt.err (!%p2803_p2)
}
  0xc4   : > { %s2807_s28 = scalar_lea.vmem %s595_s16, 16  ;;  %s2814_s18 = scalar_lea.vmem %s595_s16, 32 }
  0xc5   : > { %p2808_p5 = scmp.ne.s32.totalorder %s595_s16, %s2807_s28  ;;  %p2815_p10 = scmp.lt.s32.totalorder %s595_s16, %s595_s16 }
  0xc6   : > { %p2816_p11 = scmp.lt.s32.totalorder %s2814_s18, %s2807_s28 }
  0xc7   : > { %p2810_p7 = pnand %p2808_p5, %p3388_p8 }
  0xc8   : > { %p2817_p12 = por %p2816_p11, %p2815_p10 }
  0xc9   : > { %p2811_p9 = pneg %p2810_p7 }
  0xcb   : > { %p2818_p4 = pnand %p2817_p12, %p2811_p9 }
  0xcd   : > { %2821 = shalt.err (!%p2818_p4)
}
  0xce   : > { %2478 = dma.hbm_to_vmem [thread:$0]  (!%p3372_p6), %s4101_s13, 16, %s595_s16, [#allocation26]  }
  0xcf   : > { %s3221_s22 = smov [#allocation12]   ;;  %s4142_s4 = sld [smem:[#allocation53_spill]] }
  0xd0   : > { %s484_s30 = sshll.u32 %s3221_s22, 4  ;;  %s485_s30 = int_to_ptr.vmem [resolvable:$true] %s484_s30 }
  0xd5   : > { %s2822_s24 = scalar_lea.hbm %s4142_s4, 256 }
  0xd6   : > { %p2823_p13 = scmp.ne.s32.totalorder %s4142_s4, %s2822_s24  ;;  %p2829_p3 = scmp.lt.u32.totalorder %s2822_s24, %s4142_s4 }
  0xd8   : > { %p2825_p0 = pnand %p2823_p13, %p3388_p8 }
  0xda   : > { %p2826_p1 = pneg %p2825_p0 }
  0xdc   : > { %p2831_p2 = pnand %p2829_p3, %p2826_p1 }
  0xde   : > { %2834 = shalt.err (!%p2831_p2)
}
  0xdf   : > { %s2835_s16 = scalar_lea.vmem %s485_s30, 256  ;;  %p2843_p10 = scmp.lt.s32.totalorder %s485_s30, %s485_s30 }
  0xe0   : > { %p2836_p5 = scmp.ne.s32.totalorder %s485_s30, %s2835_s16  ;;  %p2844_p11 = scmp.lt.s32.totalorder %s2835_s16, %s2835_s16 }
  0xe2   : > { %p2838_p7 = pnand %p2836_p5, %p3388_p8  ;;  %p2845_p12 = por %p2844_p11, %p2843_p10 }
  0xe4   : > { %p2839_p9 = pneg %p2838_p7 }
  0xe6   : > { %p2846_p4 = pnand %p2845_p12, %p2839_p9 }
  0xe8   : > { %2849 = shalt.err (!%p2846_p4)
}
  0xe9   : > { %s3222_s18 = smov 64   ;;  %s3223_s17 = smov 4  }
  0xea   : > { %2451 = dma.hbm_to_vmem [thread:$0]  (!%p3372_p6), %s4142_s4, 256, %s485_s30, [#allocation11], %s3222_s18, %s3222_s18, %s3223_s17  }
  0xeb   : > { %s3224_s29 = smov [#allocation15]   ;;  %s3225_s24 = smov [#allocation18]  }
  0xec   : > { %s508_s19 = sshll.u32 %s3224_s29, 4  ;;  %s532_s20 = sshll.u32 %s3225_s24, 4  ;;  %s509_s19 = int_to_ptr.vmem [resolvable:$true] %s508_s19  ;;  %s3552_s20 = int_to_ptr.vmem [resolvable:$true] %s532_s20 }
  0xed   : > { %s4143_s6 = sld [smem:[#allocation55_spill]] }
  0xf3   : > { %s2850_s28 = scalar_lea.hbm %s4143_s6, 256 }
  0xf4   : > { %p2851_p13 = scmp.ne.s32.totalorder %s4143_s6, %s2850_s28  ;;  %p2857_p3 = scmp.lt.u32.totalorder %s2850_s28, %s4143_s6 }
  0xf6   : > { %p2853_p0 = pnand %p2851_p13, %p3388_p8 }
  0xf8   : > { %p2854_p1 = pneg %p2853_p0 }
  0xfa   : > { %p2859_p2 = pnand %p2857_p3, %p2854_p1 }
  0xfc   : > { %2862 = shalt.err (!%p2859_p2)
}
  0xfd   : > { %s2863_s22 = scalar_lea.vmem %s509_s19, 256  ;;  %p2871_p10 = scmp.lt.s32.totalorder %s509_s19, %s509_s19 }
  0xfe   : > { %p2864_p5 = scmp.ne.s32.totalorder %s509_s19, %s2863_s22  ;;  %p2872_p11 = scmp.lt.s32.totalorder %s2863_s22, %s2863_s22 }
 0x100   : > { %p2866_p7 = pnand %p2864_p5, %p3388_p8  ;;  %p2873_p12 = por %p2872_p11, %p2871_p10 }
 0x102   : > { %p2867_p9 = pneg %p2866_p7 }
 0x104   : > { %p2874_p4 = pnand %p2873_p12, %p2867_p9 }
 0x106   : > { %2877 = shalt.err (!%p2874_p4)
}
 0x107   : > { %2457 = dma.hbm_to_vmem [thread:$0]  (!%p3372_p6), %s4143_s6, 256, %s509_s19, [#allocation14], %s3222_s18, %s3222_s18, %s3223_s17  }
 0x108   : > { %s2878_s25 = scalar_lea.hbm %s4096_s8, 256 }
 0x109   : > { %p2879_p13 = scmp.ne.s32.totalorder %s4096_s8, %s2878_s25  ;;  %p2885_p3 = scmp.lt.u32.totalorder %s2878_s25, %s4096_s8 }
 0x10b   : > { %p2881_p0 = pnand %p2879_p13, %p3388_p8 }
 0x10d   : > { %p2882_p1 = pneg %p2881_p0 }
 0x10f   : > { %p2887_p2 = pnand %p2885_p3, %p2882_p1 }
 0x111   : > { %2890 = shalt.err (!%p2887_p2)
}
 0x112   : > { %s2891_s19 = scalar_lea.vmem %s3552_s20, 256  ;;  %p2899_p10 = scmp.lt.s32.totalorder %s3552_s20, %s3552_s20 }
 0x113   : > { %p2892_p5 = scmp.ne.s32.totalorder %s3552_s20, %s2891_s19  ;;  %p2900_p11 = scmp.lt.s32.totalorder %s2891_s19, %s2891_s19 }
 0x115   : > { %p2894_p7 = pnand %p2892_p5, %p3388_p8  ;;  %p2901_p12 = por %p2900_p11, %p2899_p10 }
 0x117   : > { %p2895_p9 = pneg %p2894_p7 }
 0x119   : > { %p2902_p4 = pnand %p2901_p12, %p2895_p9 }
 0x11b   : > { %2905 = shalt.err (!%p2902_p4)
}
 0x11c   : > { %2463 = dma.hbm_to_vmem [thread:$0]  (!%p3372_p6), %s4096_s8, 256, %s3552_s20, [#allocation17], %s3222_s18, %s3222_s18, %s3223_s17  }
 0x11d   : > { %s3226_s29 = smov [#allocation21]   ;;  %s3227_s23 = smov [#allocation24]  }
 0x11e   : > { %s556_s24 = sshll.u32 %s3226_s29, 4  ;;  %s580_s25 = sshll.u32 %s3227_s23, 4  ;;  %s557_s24 = int_to_ptr.vmem [resolvable:$true] %s556_s24  ;;  %s3601_s25 = int_to_ptr.vmem [resolvable:$true] %s580_s25 }
 0x11f   : > { %s2906_s0 = scalar_lea.hbm %s4098_s10, 256 }
 0x120   : > { %p2907_p13 = scmp.ne.s32.totalorder %s4098_s10, %s2906_s0  ;;  %p2913_p3 = scmp.lt.u32.totalorder %s2906_s0, %s4098_s10 }
 0x122   : > { %p2909_p0 = pnand %p2907_p13, %p3388_p8 }
 0x124   : > { %p2910_p1 = pneg %p2909_p0 }
 0x126   : > { %p2915_p2 = pnand %p2913_p3, %p2910_p1 }
 0x128   : > { %2918 = shalt.err (!%p2915_p2)
}
 0x129   : > { %s2919_s2 = scalar_lea.vmem %s557_s24, 256  ;;  %p2927_p10 = scmp.lt.s32.totalorder %s557_s24, %s557_s24 }
 0x12a   : > { %p2920_p5 = scmp.ne.s32.totalorder %s557_s24, %s2919_s2  ;;  %p2928_p11 = scmp.lt.s32.totalorder %s2919_s2, %s2919_s2 }
 0x12c   : > { %p2922_p7 = pnand %p2920_p5, %p3388_p8  ;;  %p2929_p12 = por %p2928_p11, %p2927_p10 }
 0x12e   : > { %p2923_p9 = pneg %p2922_p7 }
 0x130   : > { %p2930_p4 = pnand %p2929_p12, %p2923_p9 }
 0x132   : > { %2933 = shalt.err (!%p2930_p4)
}
 0x133   : > { %2469 = dma.hbm_to_vmem [thread:$0]  (!%p3372_p6), %s4098_s10, 256, %s557_s24, [#allocation20], %s3222_s18, %s3222_s18, %s3223_s17  }
 0x134   : > { %s2934_s0 = scalar_lea.hbm %s4100_s12, 256 }
 0x135   : > { %p2935_p13 = scmp.ne.s32.totalorder %s4100_s12, %s2934_s0  ;;  %p2941_p3 = scmp.lt.u32.totalorder %s2934_s0, %s4100_s12 }
 0x137   : > { %p2937_p0 = pnand %p2935_p13, %p3388_p8 }
 0x139   : > { %p2938_p1 = pneg %p2937_p0 }
 0x13b   : > { %p2943_p2 = pnand %p2941_p3, %p2938_p1 }
 0x13d   : > { %2946 = shalt.err (!%p2943_p2)
}
 0x13e   : > { %s2947_s24 = scalar_lea.vmem %s3601_s25, 256  ;;  %p2955_p10 = scmp.lt.s32.totalorder %s3601_s25, %s3601_s25 }
 0x13f   : > { %p2948_p5 = scmp.ne.s32.totalorder %s3601_s25, %s2947_s24  ;;  %p2956_p11 = scmp.lt.s32.totalorder %s2947_s24, %s2947_s24 }
 0x141   : > { %p2950_p7 = pnand %p2948_p5, %p3388_p8  ;;  %p2957_p12 = por %p2956_p11, %p2955_p10 }
 0x143   : > { %p2951_p9 = pneg %p2950_p7 }
 0x145   : > { %p2958_p4 = pnand %p2957_p12, %p2951_p9 }
 0x147   : > { %2961 = shalt.err (!%p2958_p4)
}
 0x148   : > { %2475 = dma.hbm_to_vmem [thread:$0]  (!%p3372_p6), %s4100_s12, 256, %s3601_s25, [#allocation23], %s3222_s18, %s3222_s18, %s3223_s17  }
 0x149   : > { %s3228_s23 = smov [#allocation27]   ;;  %s3229_s16 = smov [#allocation28]  }
 0x14a   : > { %s604_s28 = sshll.u32 %s3228_s23, 4  ;;  %s618_s0 = sshll.u32 %s3229_s16, 4  ;;  %s605_s28 = int_to_ptr.vmem [resolvable:$true] %s604_s28  ;;  %s3650_s0 = int_to_ptr.vmem [resolvable:$true] %s618_s0 }
 0x14b   : > { %s2962_s22 = scalar_lea.hbm %s4102_s14, 1024 }
 0x14c   : > { %p2963_p13 = scmp.ne.s32.totalorder %s4102_s14, %s2962_s22  ;;  %p2969_p3 = scmp.lt.u32.totalorder %s2962_s22, %s4102_s14 }
 0x14e   : > { %p2965_p0 = pnand %p2963_p13, %p3388_p8 }
 0x150   : > { %p2966_p1 = pneg %p2965_p0 }
 0x152   : > { %p2971_p2 = pnand %p2969_p3, %p2966_p1 }
 0x154   : > { %2974 = shalt.err (!%p2971_p2)
}
 0x155   : > { %s2975_s29 = scalar_lea.vmem %s605_s28, 1024  ;;  %p2983_p10 = scmp.lt.s32.totalorder %s605_s28, %s605_s28 }
 0x156   : > { %p2976_p5 = scmp.ne.s32.totalorder %s605_s28, %s2975_s29  ;;  %p2984_p11 = scmp.lt.s32.totalorder %s2975_s29, %s2975_s29 }
 0x158   : > { %p2978_p7 = pnand %p2976_p5, %p3388_p8  ;;  %p2985_p12 = por %p2984_p11, %p2983_p10 }
 0x15a   : > { %p2979_p9 = pneg %p2978_p7 }
 0x15c   : > { %p2986_p4 = pnand %p2985_p12, %p2979_p9 }
 0x15e   : > { %2989 = shalt.err (!%p2986_p4)
}
 0x15f   : > { %2481 = dma.hbm_to_vmem [thread:$0]  (!%p3372_p6), %s4102_s14, 1024, %s605_s28, [#allocation26], %s3222_s18, %s3222_s18, %s3223_s17  }
 0x160   : > { %s2990_s22 = scalar_lea.hbm %s4103_s15, 16 }
 0x161   : > { %p2991_p13 = scmp.ne.s32.totalorder %s4103_s15, %s2990_s22  ;;  %p2997_p3 = scmp.lt.u32.totalorder %s2990_s22, %s4103_s15 }
 0x163   : > { %p2993_p0 = pnand %p2991_p13, %p3388_p8 }
 0x165   : > { %p2994_p1 = pneg %p2993_p0 }
 0x167   : > { %p2999_p2 = pnand %p2997_p3, %p2994_p1 }
 0x169   : > { %3002 = shalt.err (!%p2999_p2)
}
 0x16a   : > { %s3003_s18 = scalar_lea.vmem %s3650_s0, 16  ;;  %s3010_s17 = scalar_lea.vmem %s3650_s0, 32 }
 0x16b   : > { %p3004_p5 = scmp.ne.s32.totalorder %s3650_s0, %s3003_s18  ;;  %p3011_p10 = scmp.lt.s32.totalorder %s3650_s0, %s3650_s0 }
 0x16c   : > { %p3012_p11 = scmp.lt.s32.totalorder %s3010_s17, %s3003_s18 }
 0x16d   : > { %p3006_p7 = pnand %p3004_p5, %p3388_p8 }
 0x16e   : > { %p3013_p12 = por %p3012_p11, %p3011_p10 }
 0x16f   : > { %p3007_p9 = pneg %p3006_p7 }
 0x171   : > { %p3014_p4 = pnand %p3013_p12, %p3007_p9 }
 0x173   : > { %3017 = shalt.err (!%p3014_p4)
}
 0x174   : > { %s4144_s1 = sld [smem:[#allocation46_spill]]  ;;  %s4145_s23 = sld [smem:[#allocation45_spill]] }
 0x175   : > { %s4146_s16 = sld [smem:[#allocation47_spill]]  ;;  %s2133_s21 = sadd.s32 4294967294, %s3212_s27  }
 0x176   : > { %2484 = dma.hbm_to_vmem [thread:$0]  (!%p3372_p6), %s4103_s15, 16, %s3650_s0, [#allocation29]  }
 0x177   : > { %s3699_s30 = sadd.s32 1, %s3212_s27   ;;  %s54_s22 = sadd.s32 1, %s3208_s26 }
 0x178   : > { %s51_s19 = ssub.s32 %s3212_s27, %s3699_s30  ;;  %p62_p0 = scmp.eq.s32.totalorder %s3212_s27, 0 }
 0x179   : > { %p52_p8 = scmp.eq.s32.totalorder %s51_s19, 0  ;;  %p417_p7 = scmp.eq.s32.totalorder %s2133_s21, 1 }
 0x17a   : > { %p61_p13 = scmp.ne.s32.totalorder %s3208_s26, %s4144_s1  ;;  %p67_p1 = scmp.ne.s32.totalorder %s4144_s1, %s4145_s23 }
 0x17b   : > { %s3710_s20 = scalar_select %p52_p8, %s3208_s26, %s54_s22  }
 0x17c   : > { %p3712_p3 = por %p62_p0, %p61_p13  ;;  %p4148_p2 = scmp.eq.s32.totalorder %s4146_s16, 0 }
 0x17d   : > { %p411_p5 = scmp.eq.s32.totalorder %s4146_s16, 1  ;;  %p2513_p9 = scmp.lt.s32.totalorder %s3212_s27, 2 }
 0x17e   : > { %p3718_p6 = por %p4148_p2, %p67_p1  ;;  %s3725_s2 = sand.u32 1, %s3208_s26  }
 0x17f   : > { %p3727_p10 = por %p411_p5, %p61_p13  ;;  %p3731_p11 = por %p417_p7, %p67_p1 }
 0x180   : > { %s4149_s0 = scalar_select %p3718_p6, 1, 0 }
 0x181   : > { %s4150_s25 = scalar_select %p3727_p10, 1, 0 }
 0x182   : > { %s4151_s18 = scalar_select %p3731_p11, 1, 0 }
 0x183   : > { %s2150_s17 = sshll.u32 %s3725_s2, 3  ;;  %s2151_s28 = sshll.u32 %s3212_s27, 7 }
 0x184   : > { %s4152_s23 = sld [smem:[#allocation49_spill]]  ;;  %s633_s21 = scalar_lea.vmem [#allocation4], %s2150_s17 }
 0x185   : > { %s640_s19 = sshll.u32 %s633_s21, 4  ;;  %p3746_p12 = pnand %p2513_p9, %p3712_p3  ;;  %s3742_s19 = int_to_ptr.vmem [resolvable:$true] %s640_s19 }
 0x186   : > { %s630_s4 = scalar_lea.sflag [#allocation5], %s3725_s2 }
 0x187   : > { %p3020_p8 = pneg %p3746_p12 }
 0x18a   : > { %s3740_s16 = scalar_lea.hbm %s4152_s23, %s2151_s28  ;;  %s3023_s24 = scalar_lea.hbm %s4152_s23, 256 }
 0x18b   : > { %s3018_s29 = scalar_lea.hbm %s3740_s16, 128  ;;  %p3024_p1 = scmp.lt.u32.totalorder %s3740_s16, %s4152_s23 }
 0x18c   : > { %p3019_p4 = scmp.ne.s32.totalorder %s3740_s16, %s3018_s29  ;;  %p3025_p3 = scmp.lt.u32.totalorder %s3023_s24, %s3018_s29 }
 0x18d   : > { %p3027_p5 = scmp.lt.u32.totalorder %s3018_s29, %s3740_s16 }
 0x18e   : > { %p3021_p13 = pnand %p3020_p8, %p3019_p4  ;;  %p3026_p2 = por %p3025_p3, %p3024_p1 }
 0x190   : > { %p3022_p0 = pneg %p3021_p13  ;;  %p3028_p7 = por %p3027_p5, %p3026_p2 }
 0x192   : > { %p3029_p9 = pnand %p3028_p7, %p3022_p0 }
 0x194   : > { %3032 = shalt.err (!%p3029_p9)
}
 0x195   : > { %s3033_s3 = scalar_lea.vmem %s3742_s19, 128  ;;  %s3230_s17 = smov [#allocation4]  }
 0x196   : > { %p3034_p4 = scmp.ne.s32.totalorder %s3742_s19, %s3033_s3  ;;  %s3038_s28 = sshll.u32 %s3230_s17, 4  ;;  %s3039_s28 = int_to_ptr.vmem [resolvable:$false] %s3038_s28 }
 0x197   : > { %s3040_s1 = scalar_lea.vmem %s3039_s28, 256  ;;  %p3041_p10 = scmp.lt.s32.totalorder %s3742_s19, %s3039_s28 }
 0x198   : > { %p3036_p13 = pnand %p3034_p4, %p3020_p8  ;;  %p3042_p1 = scmp.lt.s32.totalorder %s3040_s1, %s3033_s3 }
 0x19a   : > { %p3037_p11 = pneg %p3036_p13  ;;  %p3043_p3 = por %p3042_p1, %p3041_p10 }
 0x19c   : > { %p3044_p2 = pnand %p3043_p3, %p3037_p11 }
 0x19e   : > { %3047 = shalt.err (!%p3044_p2)
}
 0x19f   : > { %2488 = dma.hbm_to_vmem [thread:$0]  (!%p3746_p12), %s3740_s16, 128, %s3742_s19, %s630_s4  }
 0x1a0   : > { %s2152_s29 = sshll.u32 %s3212_s27, 4  ;;  %s650_s24 = scalar_lea.vmem [#allocation7], %s3725_s2 }
 0x1a1   : > { %s657_s21 = sshll.u32 %s650_s24, 4  ;;  %s4154_s6 = sld [smem:[#allocation50_spill]]  ;;  %s658_s21 = int_to_ptr.vmem [resolvable:$true] %s657_s21 }
 0x1a2   : > { %s4155_s3 = sand.u32 1, %s3212_s27  }
 0x1a3   : > { %s648_s1 = scalar_lea.sflag [#allocation8], %s4155_s3 }
 0x1a7   : > { %s3782_s28 = scalar_lea.hbm %s4154_s6, %s2152_s29  ;;  %s3053_s16 = scalar_lea.hbm %s4154_s6, 32 }
 0x1a8   : > { %s3048_s7 = scalar_lea.hbm %s3782_s28, 16  ;;  %p3054_p5 = scmp.lt.u32.totalorder %s3782_s28, %s4154_s6 }
 0x1a9   : > { %p3049_p10 = scmp.ne.s32.totalorder %s3782_s28, %s3048_s7  ;;  %p3055_p7 = scmp.lt.u32.totalorder %s3053_s16, %s3048_s7 }
 0x1aa   : > { %p3057_p4 = scmp.lt.u32.totalorder %s3048_s7, %s3782_s28 }
 0x1ab   : > { %p3051_p11 = pnand %p3049_p10, %p3020_p8  ;;  %p3056_p9 = por %p3055_p7, %p3054_p5 }
 0x1ad   : > { %p3052_p0 = pneg %p3051_p11  ;;  %p3058_p13 = por %p3057_p4, %p3056_p9 }
 0x1af   : > { %p3059_p1 = pnand %p3058_p13, %p3052_p0 }
 0x1b1   : > { %3062 = shalt.err (!%p3059_p1)
}
 0x1b2   : > { %s3063_s29 = scalar_lea.vmem %s658_s21, 16  ;;  %s3231_s24 = smov [#allocation7]  }
 0x1b3   : > { %p3064_p3 = scmp.ne.s32.totalorder %s658_s21, %s3063_s29  ;;  %s3068_s17 = sshll.u32 %s3231_s24, 4  ;;  %s3069_s17 = int_to_ptr.vmem [resolvable:$false] %s3068_s17 }
 0x1b4   : > { %s3070_s3 = scalar_lea.vmem %s3069_s17, 32  ;;  %p3071_p11 = scmp.lt.s32.totalorder %s658_s21, %s3069_s17 }
 0x1b5   : > { %p3066_p2 = pnand %p3064_p3, %p3020_p8  ;;  %p3072_p6 = scmp.lt.s32.totalorder %s3070_s3, %s3063_s29 }
 0x1b7   : > { %p3067_p10 = pneg %p3066_p2  ;;  %p3073_p5 = por %p3072_p6, %p3071_p11 }
 0x1b9   : > { %p3074_p7 = pnand %p3073_p5, %p3067_p10 }
 0x1bb   : > { %3077 = shalt.err (!%p3074_p7)
}
 0x1bc   : > { %2491 = dma.hbm_to_vmem [thread:$0]  (!%p3746_p12), %s3782_s28, 16, %s658_s21, %s648_s1  }
 0x1bd   : > { %s4156_s7 = sld [smem:[#allocation48_spill]] }
 0x1c3   : > { %p4157_p0 = scmp.ne.s32.totalorder %s4156_s7, 0 }
 0x1c4   : > { %s4158_s4 = sld [smem:[#allocation46_spill]] (!%p4157_p0)  ;;  %p4159_p6 = scmp.ne.s32.totalorder (!%p4157_p0), %s4149_s0, 0 }
 0x1c5   : > { %666 = sbr.rel (%p4157_p0) target bundleno = 3087 (0xc0f), region = 84 }
 0x1ca   : > { %s3808_s2 = sand.u32 (!%p4157_p0), 1, %s4158_s4  }
 0x1cb   : > { %s4119_s16 = sshll.u32 (!%p4157_p0), %s3808_s2, 3  ;;  %s669_s5 = scalar_lea.sflag (!%p4157_p0), [#allocation5], %s3808_s2 }
 0x1cc   : > { %s672_s19 = scalar_lea.vmem [#allocation4], %s4119_s16 }
 0x1cd   : > { %3151 = dma.done.wait (%p4159_p6), %s669_s5, 128  }
 0x1ce   : > { %3153 = vsyncadd (%p4159_p6), %s669_s5, 4294967168  ;;  %s4160_s22 = sld [smem:[#allocation47_spill]]  ;;  %s680_s1 = scalar_lea.vmem [#allocation7], %s3808_s2 }
 0x1d4   : > { %s677_s21 = sand.u32 1, %s4160_s22  }
 0x1d5   : > { %s678_s28 = scalar_lea.sflag [#allocation8], %s677_s21 }
 0x1d6   : > { %3155 = dma.done.wait (%p4159_p6), %s678_s28, 16  }
 0x1d7   : > { %3157 = vsyncadd (%p4159_p6), %s678_s28, 4294967280  ;;  %p4161_p12 = scmp.eq.s32.totalorder %s4160_s22, 0 }
 0x1d9   : > { %3159 = dma.done.wait (%p4161_p12), [#allocation8], 16   ;;  %p4162_p8 = pmov %p4161_p12 }
 0x1db   : > { %3161 = vsyncadd (%p4162_p8), [#allocation8], 4294967280  ;;  %p4163_p9 = pmov %p4162_p8 }
 0x1dc   : > { %p4164_p4 = pmov %p4162_p8 }
 0x1dd   : > { %3163 = dma.done.wait (%p4163_p9), [#allocation11], 272  }
 0x1de   : > { %3165 = vsyncadd (%p4164_p4), [#allocation11], 4294967024  ;;  %p4165_p13 = pmov %p4164_p4 }
 0x1df   : > { %p4166_p1 = pmov %p4164_p4 }
 0x1e0   : > { %3167 = dma.done.wait (%p4165_p13), [#allocation14], 272  }
 0x1e1   : > { %3169 = vsyncadd (%p4166_p1), [#allocation14], 4294967024  ;;  %p4167_p3 = pmov %p4166_p1 }
 0x1e2   : > { %p4168_p2 = pmov %p4166_p1 }
 0x1e3   : > { %3171 = dma.done.wait (%p4167_p3), [#allocation17], 272  }
 0x1e4   : > { %3173 = vsyncadd (%p4168_p2), [#allocation17], 4294967024  ;;  %p4169_p10 = pmov %p4166_p1 }
 0x1e5   : > { %p4170_p11 = pmov %p4166_p1 }
 0x1e6   : > { %3175 = dma.done.wait (%p4169_p10), [#allocation20], 272  }
 0x1e7   : > { %3177 = vsyncadd (%p4170_p11), [#allocation20], 4294967024  ;;  %p4171_p5 = pmov %p4166_p1 }
 0x1e8   : > { %p4172_p7 = pmov %p4166_p1 }
 0x1e9   : > { %3179 = dma.done.wait (%p4171_p5), [#allocation23], 272  }
 0x1ea   : > { %3181 = vsyncadd (%p4172_p7), [#allocation23], 4294967024  ;;  %p4173_p0 = pmov %p4166_p1 }
 0x1ec   : > { %3183 = dma.done.wait (%p4173_p0), [#allocation26], 1040   ;;  %p4174_p6 = pmov %p4173_p0 }
 0x1ed   : > { %p4175_p12 = pmov %p4173_p0 }
 0x1ee   : > { %3185 = vsyncadd (%p4174_p6), [#allocation26], 4294966256 }
 0x1ef   : > { %3187 = dma.done.wait (%p4175_p12), [#allocation29], 16   ;;  %p4176_p8 = pmov %p4173_p0 }
 0x1f0   : > { %vm801_vm0 = vcmask 261120   ;;  %v3856_v0 = vld [vmem:[%s672_s19] sm:$0xff]  ;;  %v2586_v7 = vld [vmem:[#allocation12] sm:$0xff]   ;;  %v3232_v8 = vmov 0.0   ;;  %vm3233_vm1 = vmmov 0   ;;  %vm1025_vm2 = vcmask 60416  }
 0x1f1   : > { %3189 = vsyncadd (%p4176_p8), [#allocation29], 4294967280  ;;  %v802_v1 = vsel %vm801_vm0, %v3856_v0, 0.0  ;;  %2270 = vmatprep.subr.bf16.mxu0 %v3232_v8  ;;  %2274 = vmatprep.mubr.msk.bf16.mxu0 %vm3233_vm1, %v3232_v8  ;;  %v2587_v9 = vld [vmem:[#allocation12 + $0x8] sm:$0xff]   ;;  %v3870_v14 = vld [vmem:[#allocation9] ss:$0 sm:$0xff] }
 0x1f2   : > { %803 = vadd.xlane.f32.xlu0 %v802_v1  ;;  %2271 = vmatpush3.bf16.msra.mxu0 %v2586_v7  ;;  %v3872_v16 = vld [vmem:[#allocation10] ss:$0 sm:$0xff]  ;;  %v2588_v19 = vld [vmem:[#allocation15] sm:$0xff]   ;;  %v2590_v22 = vld [vmem:[#allocation18] sm:$0xff]   ;;  %s3234_s0 = smov 120   ;;  %s3235_s29 = smov 112  }
 0x1f3   : > { %2294 = vmatprep.subr.bf16.mxu1 %v3232_v8  ;;  %2272 = vmatprep.subr.bf16.mxu0 %v3232_v8  ;;  %v2589_v21 = vld [vmem:[#allocation15 + $0x8] sm:$0xff]   ;;  %v2591_v23 = vld [vmem:[#allocation18 + $0x8] sm:$0xff]   ;;  %v2177_v32 = vld [vmem:[#allocation16] ss:$0 sm:$0xff]  ;;  %vm1099_vm3 = vcmask 64512   ;;  %s3236_s24 = smov 104  }
 0x1f4   : > { %2296 = vmatprep.mubr.msk.bf16.mxu1 %vm3233_vm1, %v3232_v8  ;;  %v2173_v24 = vld [vmem:[#allocation13] ss:$0 sm:$0xff]  ;;  %v2181_v39 = vld [vmem:[#allocation19] ss:$0 sm:$0xff]  ;;  %vm1363_vm4 = vcmask 1043456   ;;  %s2170_s17 = sshll.u32 %s3808_s2, 5 }
 0x1f5   : > { %s3943_s3 = scalar_lea.vmem [#allocation31], %s2170_s17  ;;  %s3237_s7 = smov 8   ;;  %vm1554_vm5 = vcmask 126016   ;;  %vm1563_vm6 = vcmask 191616   ;;  %vm1572_vm7 = vcmask 257216  }
 0x1f6   : > { %2273 = vmatpush3.bf16.msra.mxu0 %v2587_v9  ;;  %s3238_s4 = smov 16   ;;  %s3239_s5 = smov 24  }
 0x1f7   : > { %2278 = vmatprep.subr.bf16.mxu0 %v3232_v8  ;;  %s2229_s19 = sshll.u32 %s4160_s22, 9  ;;  %s1875_s21 = sshll.u32 %s3943_s3, 4  ;;  %s4009_s21 = int_to_ptr.vmem [resolvable:$true] %s1875_s21 }
 0x1f8   : > { %s3078_s17 = scalar_lea.vmem %s4009_s21, 512  ;;  %p4178_p4 = scmp.ne.s32.totalorder %s4150_s25, 0 }
 0x1f9   : > { %p3079_p9 = scmp.ne.s32.totalorder %s4009_s21, %s3078_s17 }
 0x1fb   : > { %p3080_p13 = pnand %p3079_p9, %p4178_p4 }
 0x1fd   : > { %p3081_p1 = pneg %p3080_p13 }
 0x27f   : > { %v804_v2 = vpop.xlane.xlu0 %803 }
 0x280   : > { %v806_v3 = vmul.f32 0.03125, %v804_v2 }
 0x282   : > { %v807_v4 = vsub.f32 %v3856_v0, %v806_v3  ;;  %v1287_v3 = vlaneseq }
 0x284   : > { %v808_v5 = vmul.f32 %v807_v4, %v807_v4 }
 0x286   : > { %v809_v6 = vsel %vm801_vm0, %v808_v5, 0.0 }
 0x287   : > { %810 = vadd.xlane.f32.xlu0 %v809_v6  ;;  %v1288_v6 = vshrl.u32 %v1287_v3, 7 }
 0x289   : > { %v1289_v9 = vsub.s32 0, %v1288_v6 }
 0x314   : > { %v811_v10 = vpop.xlane.xlu0 %810 }
 0x315   : > { %v812_v11 = vmul.f32 0.03125, %v811_v10 }
 0x317   : > { %v813_v12 = vadd.f32 1e-12, %v812_v11 }
 0x319   : > { %2604 = vrsqrt.f32 %v813_v12 }
 0x323   : > { %v2605_v13 = vpop.eup %2604 }
 0x324   : > { %v815_v15 = vmul.f32 %v2605_v13, %v807_v4  ;;  %v798_v4 = vld [vmem:[%s680_s1] sm:$0x1] }
 0x325   : > { %v1284_v5 = vsub.f32 1.0, %v798_v4 }
 0x326   : > { %v822_v17 = vmul.f32 %v3870_v14, %v815_v15 }
 0x327   : > { %v1285_v7 = vmul.f32 10000.0, %v1284_v5 }
 0x328   : > { %v829_v18 = vadd.f32 %v3872_v16, %v822_v17 }
 0x329   : > { %v1290_v10 = vrot.slane %v1285_v7, %v1289_v9 }
 0x32a   : > { %v830_v20 = vpack.c.bf16 %v829_v18, %v829_v18 }
 0x32c   : > { %2275 = vmatmul.mubr.msk.bf16.vlgmr.msra.gmra.mrb[0].mxu0 %vm801_vm0, %v830_v20 }
 0x32d   : > { %2279 = vmatpush3.bf16.msra.mxu0 %v2588_v19  ;;  %2282 = vmatprep.mubr.msk.bf16.mxu0 %vm3233_vm1, %v3232_v8 }
 0x32e   : > { %2280 = vmatprep.subr.bf16.mxu0 %v3232_v8 }
 0x331   : > { %2281 = vmatpush3.bf16.msra.mxu0 %v2589_v21 }
 0x332   : > { %2286 = vmatprep.subr.bf16.mxu0 %v3232_v8 }
 0x334   : > { %2283 = vmatmul.mubr.msk.bf16.vlgmr.msra.gmra.mrb[4].mxu0 %vm801_vm0, %v830_v20 }
 0x335   : > { %2287 = vmatpush3.bf16.msra.mxu0 %v2590_v22  ;;  %2290 = vmatprep.mubr.msk.bf16.mxu0 %vm3233_vm1, %v3232_v8 }
 0x336   : > { %2288 = vmatprep.subr.bf16.mxu0 %v3232_v8 }
 0x339   : > { %2289 = vmatpush3.bf16.msra.mxu0 %v2591_v23 }
 0x33a   : > { %2300 = vmatprep.subr.bf16.mxu0 %v3232_v8 }
 0x33c   : > { %2291 = vmatmul.mubr.msk.bf16.vlgmr.msra.gmra.mrb[8].mxu0 %vm801_vm0, %v830_v20 }
 0x33d   : > { %2302 = vmatprep.mubr.msk.bf16.mxu0 %vm3233_vm1, %v3232_v8 }
 0x3ff   : > { %v891_v25 = vpop.f32.mrb[0].mxu0 }
 0x400   : > { %v892_v26 = vadd.f32 %v2173_v24, %v891_v25  ;;  %v2276_v27 = vpop.f32.mrb[1].mxu0 }
 0x401   : > { %v894_v28 = vpop.f32.mrb[2].mxu0 }
 0x402   : > { %v897_v29 = vmul.f32 0.35355338, %v892_v26  ;;  %v2277_v30 = vpop.f32.mrb[3].mxu0 }
 0x404   : > { %v1024_v31 = vpack.c.bf16 %v897_v29, %v897_v29 }
 0x406   : > { %1026 = vst.msk [vmem:[#allocation2] sm:$0xf] %vm1025_vm2, %v1024_v31  ;;  %1036 = vrot.lane.b32.xlu0 %v1024_v31, %s3234_s0 }
 0x407   : > { %v955_v33 = vpop.f32.mrb[4].mxu0 }
 0x408   : > { %v956_v34 = vadd.f32 %v2177_v32, %v955_v33  ;;  %v2284_v35 = vpop.f32.mrb[5].mxu0 }
 0x409   : > { %v958_v36 = vpop.f32.mrb[6].mxu0 }
 0x40a   : > { %v1027_v37 = vpack.c.bf16 %v956_v34, %v956_v34  ;;  %v2285_v38 = vpop.f32.mrb[7].mxu0 }
 0x40c   : > { %1029 = vst.msk [vmem:[#allocation2 + $0x10] sm:$0xf] %vm1025_vm2, %v1027_v37  ;;  %1044 = vrot.lane.b32.xlu1 %v1027_v37, %s3234_s0 }
 0x40d   : > { %v1087_v48 = vld [vmem:[#allocation2] sm:$0xf] }
 0x40f   : > { %v1018_v40 = vpop.f32.mrb[8].mxu0 }
 0x410   : > { %v1019_v41 = vadd.f32 %v2181_v39, %v1018_v40  ;;  %1062 = vrot.lane.b32.xlu1 %v1027_v37, %s3235_s29  ;;  %v2292_v42 = vpop.f32.mrb[9].mxu0 }
 0x411   : > { %v1021_v43 = vpop.f32.mrb[10].mxu0 }
 0x412   : > { %v3894_v44 = vpack.c.bf16 %v1019_v41, %v1019_v41  ;;  %v2293_v45 = vpop.f32.mrb[11].mxu0 }
 0x413   : > { %v1091_v46 = vld [vmem:[#allocation2 + $0x10] sm:$0xf] }
 0x414   : > { %1032 = vst.msk [vmem:[#allocation2 + $0x20] sm:$0xf] %vm1025_vm2, %v3894_v44  ;;  %1077 = vrot.lane.b32.xlu1 %v1027_v37, %s3236_s24  ;;  %v1104_v47 = vsel %vm1099_vm3, %v1091_v46, 0 }
 0x415   : > { %2295 = vmatpush3.bf16.xpose.msra.mxu1 %v1104_v47 }
 0x416   : > { %2306 = vmatprep.subr.bf16.mxu1 %v3232_v8 }
 0x418   : > { %1057 = vrot.lane.b32.xlu1 %v1024_v31, %s3235_s29 }
 0x41b   : > { %v1095_v62 = vld [vmem:[#allocation2 + $0x20] sm:$0xf] }
 0x41c   : > { %1072 = vrot.lane.b32.xlu1 %v1024_v31, %s3236_s24  ;;  %2297 = vmatmul.mubr.msk.bf16.vlgmr.msra.gmra.mrb[0].mxu1 %vm1099_vm3, %v1087_v48  ;;  %v1365_v1 = vsel %vm1363_vm4, %v1095_v62, 0 }
 0x41d   : > { %2308 = vmatprep.mubr.msk.bf16.mxu1 %vm3233_vm1, %v3232_v8 }
 0x478   : > { %v1037_v49 = vpop.permute.xlu0 %1036 }
 0x479   : > { %1040 = vst.msk [vmem:[#allocation2 + $0x4] sm:$0xf] %vm1025_vm2, %v1037_v49 }
 0x47e   : > { %v1045_v50 = vpop.permute.xlu1 %1044 }
 0x47f   : > { %1048 = vst.msk [vmem:[#allocation2 + $0x14] sm:$0xf] %vm1025_vm2, %v1045_v50 }
 0x480   : > { %v1088_v59 = vld [vmem:[#allocation2 + $0x4] sm:$0xf] }
 0x482   : > { %v1063_v51 = vpop.permute.xlu1 %1062 }
 0x483   : > { %1066 = vst.msk [vmem:[#allocation2 + $0x18] sm:$0xf] %vm1025_vm2, %v1063_v51 }
 0x486   : > { %v1078_v52 = vpop.permute.xlu1 %1077  ;;  %v1092_v53 = vld [vmem:[#allocation2 + $0x14] sm:$0xf] }
 0x487   : > { %1081 = vst.msk [vmem:[#allocation2 + $0x1c] sm:$0xf] %vm1025_vm2, %v1078_v52  ;;  %v1150_v54 = vsel %vm1099_vm3, %v1092_v53, 0 }
 0x488   : > { %2301 = vmatpush3.bf16.xpose.msra.mxu0 %v1150_v54 }
 0x489   : > { %2312 = vmatprep.subr.bf16.mxu0 %v3232_v8 }
 0x48a   : > { %v1058_v55 = vpop.permute.xlu1 %1057  ;;  %v1093_v56 = vld [vmem:[#allocation2 + $0x18] sm:$0xf] }
 0x48b   : > { %1061 = vst.msk [vmem:[#allocation2 + $0x8] sm:$0xf] %vm1025_vm2, %v1058_v55  ;;  %v1196_v57 = vsel %vm1099_vm3, %v1093_v56, 0 }
 0x48c   : > { %2307 = vmatpush3.bf16.xpose.msra.mxu1 %v1196_v57 }
 0x48d   : > { %2318 = vmatprep.subr.bf16.mxu1 %v3232_v8 }
 0x48e   : > { %v1073_v58 = vpop.permute.xlu1 %1072  ;;  %v1094_v60 = vld [vmem:[#allocation2 + $0x1c] sm:$0xf] }
 0x48f   : > { %1076 = vst.msk [vmem:[#allocation2 + $0xc] sm:$0xf] %vm1025_vm2, %v1073_v58  ;;  %2303 = vmatmul.mubr.msk.bf16.vlgmr.msra.gmra.mrb[12].mxu0 %vm1099_vm3, %v1088_v59  ;;  %v1242_v61 = vsel %vm1099_vm3, %v1094_v60, 0 }
 0x490   : > { %2313 = vmatpush3.bf16.xpose.msra.mxu0 %v1242_v61  ;;  %2314 = vmatprep.mubr.msk.bf16.mxu0 %vm3233_vm1, %v3232_v8 }
 0x491   : > { %2324 = vmatprep.subr.bf16.mxu0 %v3232_v8 }
 0x492   : > { %v1089_v63 = vld [vmem:[#allocation2 + $0x8] sm:$0xf] }
 0x493   : > { %2309 = vmatmul.mubr.msk.bf16.vlgmr.msra.gmra.mrb[4].mxu1 %vm1099_vm3, %v1089_v63 }
 0x494   : > { %2319 = vmatpush3.bf16.msra.mxu1 %v1365_v1  ;;  %2320 = vmatprep.mubr.msk.bf16.mxu1 %vm3233_vm1, %v3232_v8 }
 0x495   : > { %2330 = vmatprep.subr.bf16.mxu1 %v3232_v8 }
 0x496   : > { %v1090_v2 = vld [vmem:[#allocation2 + $0xc] sm:$0xf] }
 0x497   : > { %2315 = vmatmul.mubr.msk.bf16.vlgmr.msra.gmra.mrb[16].mxu0 %vm1099_vm3, %v1090_v2 }
 0x498   : > { %2326 = vmatprep.mubr.msk.bf16.mxu0 %vm3233_vm1, %v3232_v8 }
 0x4ef   : > { %v1140_v11 = vpop.f32.mrb[0].mxu1 }
 0x4f0   : > { %v1292_v12 = vsub.f32 %v1140_v11, %v1290_v10  ;;  %v2298_v13 = vpop.f32.mrb[1].mxu1 }
 0x4f1   : > { %v1143_v15 = vpop.f32.mrb[2].mxu1 }
 0x4f2   : > { %v2299_v17 = vpop.f32.mrb[3].mxu1  ;;  %v1296_v18 = vsel %vm1099_vm3, %v1292_v12, -inf }
 0x4f3   : > { %1297 = vmax.xlane.f32.xlu1 %v1296_v18 }
 0x562   : > { %v1186_v19 = vpop.f32.mrb[12].mxu0 }
 0x563   : > { %v1293_v20 = vsub.f32 %v1186_v19, %v1290_v10  ;;  %v2304_v21 = vpop.f32.mrb[13].mxu0 }
 0x564   : > { %v1189_v22 = vpop.f32.mrb[14].mxu0 }
 0x565   : > { %v2305_v23 = vpop.f32.mrb[15].mxu0  ;;  %v1299_v24 = vsel %vm1099_vm3, %v1293_v20, -inf }
 0x566   : > { %v1232_v25 = vpop.f32.mrb[4].mxu1  ;;  %1300 = vmax.xlane.f32.xlu0 %v1299_v24 }
 0x567   : > { %v1294_v26 = vsub.f32 %v1232_v25, %v1290_v10  ;;  %v2310_v27 = vpop.f32.mrb[5].mxu1 }
 0x568   : > { %v1235_v28 = vpop.f32.mrb[6].mxu1 }
 0x569   : > { %v2311_v29 = vpop.f32.mrb[7].mxu1  ;;  %v1302_v30 = vsel %vm1099_vm3, %v1294_v26, -inf }
 0x56a   : > { %1303 = vmax.xlane.f32.xlu1 %v1302_v30  ;;  %v1278_v31 = vpop.f32.mrb[16].mxu0 }
 0x56b   : > { %v1295_v32 = vsub.f32 %v1278_v31, %v1290_v10  ;;  %v2316_v33 = vpop.f32.mrb[17].mxu0 }
 0x56c   : > { %v1281_v34 = vpop.f32.mrb[18].mxu0 }
 0x56d   : > { %v2317_v35 = vpop.f32.mrb[19].mxu0  ;;  %v1305_v36 = vsel %vm1099_vm3, %v1295_v32, -inf }
 0x56e   : > { %1306 = vmax.xlane.f32.xlu1 %v1305_v36 }
 0x580   : > { %v1298_v37 = vpop.xlane.xlu1 %1297 }
 0x581   : > { %v1308_v38 = vsub.f32 %v1292_v12, %v1298_v37 }
 0x583   : > { %v1312_v39 = vmul.f32 1.442695, %v1308_v38 }
 0x585   : > { %2606 = vpow2.f32 %v1312_v39 }
 0x58f   : > { %v2607_v40 = vpop.eup %2606 }
 0x590   : > { %v1320_v41 = vsel %vm1099_vm3, %v2607_v40, 0.0 }
 0x591   : > { %1321 = vadd.xlane.f32.xlu0 %v1320_v41 }
 0x5f3   : > { %v1301_v42 = vpop.xlane.xlu0 %1300 }
 0x5f4   : > { %v1309_v43 = vsub.f32 %v1293_v20, %v1301_v42 }
 0x5f6   : > { %v1314_v45 = vmul.f32 1.442695, %v1309_v43 }
 0x5f7   : > { %v1304_v46 = vpop.xlane.xlu1 %1303 }
 0x5f8   : > { %2608 = vpow2.f32 %v1314_v45  ;;  %v1310_v47 = vsub.f32 %v1294_v26, %v1304_v46 }
 0x5fa   : > { %v1316_v48 = vmul.f32 1.442695, %v1310_v47 }
 0x5fb   : > { %v1307_v54 = vpop.xlane.xlu1 %1306 }
 0x5fc   : > { %2610 = vpow2.f32 %v1316_v48  ;;  %v1311_v55 = vsub.f32 %v1295_v32, %v1307_v54 }
 0x5fe   : > { %v1318_v56 = vmul.f32 1.442695, %v1311_v55 }
 0x602   : > { %v2609_v49 = vpop.eup %2608 }
 0x603   : > { %v1323_v50 = vsel %vm1099_vm3, %v2609_v49, 0.0 }
 0x604   : > { %1324 = vadd.xlane.f32.xlu1 %v1323_v50  ;;  %v2592_v50 = vld [vmem:[#allocation21] sm:$0xff]  }
 0x606   : > { %v2611_v51 = vpop.eup %2610 }
 0x607   : > { %v1326_v52 = vsel %vm1099_vm3, %v2611_v51, 0.0 }
 0x608   : > { %1327 = vadd.xlane.f32.xlu0 %v1326_v52 }
 0x615   : > { %1067 = vrot.lane.b32.xlu1 %v3894_v44, %s3235_s29 }
 0x61e   : > { %1052 = vrot.lane.b32.xlu0 %v3894_v44, %s3234_s0  ;;  %v1322_v53 = vpop.xlane.xlu0 %1321  ;;  %s4177_s0 = sld [smem:[#allocation58_spill]] }
 0x61f   : > { %2612 = vrcp.f32 %v1322_v53 }
 0x620   : > { %2614 = vpow2.f32 %v1318_v56 }
 0x624   : > { %s4007_s29 = scalar_lea.hbm %s4177_s0, %s2229_s19 }
 0x629   : > { %v2613_v57 = vpop.eup %2612 }
 0x62a   : > { %v1336_v58 = vmul.f32 %v2613_v57, %v1322_v53  ;;  %v2615_v63 = vpop.eup %2614 }
 0x62b   : > { %v1329_v1 = vsel %vm1099_vm3, %v2615_v63, 0.0 }
 0x62c   : > { %v1340_v59 = vsub.f32 2.0, %v1336_v58 }
 0x62e   : > { %v1344_v60 = vmul.f32 %v2613_v57, %v1340_v59 }
 0x630   : > { %v1348_v61 = vmul.f32 %v2607_v40, %v1344_v60 }
 0x632   : > { %1352 = vst.msk [vmem:[%s3943_s3] sm:$0xff] %vm1099_vm3, %v1348_v61  ;;  %v1356_v62 = vpack.c.bf16 %v1348_v61, %v1348_v61  ;;  %v2199_v61 = vld [vmem:[#allocation22] ss:$0 sm:$0xff] }
 0x634   : > { %2321 = vmatmul.mubr.msk.bf16.vlgmr.msra.gmra.mrb[8].mxu1 %vm1099_vm3, %v1356_v62 }
 0x635   : > { %2332 = vmatprep.mubr.msk.bf16.mxu1 %vm3233_vm1, %v3232_v8 }
 0x639   : > { %1330 = vadd.xlane.f32.xlu1 %v1329_v1 }
 0x64a   : > { %1082 = vrot.lane.b32.xlu1 %v3894_v44, %s3236_s24  ;;  %s1849_s24 = scalar_lea.sflag [#allocation32], %s3808_s2 }
 0x691   : > { %v1325_v2 = vpop.xlane.xlu1 %1324 }
 0x692   : > { %2616 = vrcp.f32 %v1325_v2 }
 0x695   : > { %v1328_v3 = vpop.xlane.xlu0 %1327  ;;  %v1068_v4 = vpop.permute.xlu1 %1067 }
 0x696   : > { %2618 = vrcp.f32 %v1328_v3  ;;  %1071 = vst.msk [vmem:[#allocation2 + $0x28] sm:$0xf] %vm1025_vm2, %v1068_v4 }
 0x699   : > { %v1053_v5 = vpop.permute.xlu0 %1052 }
 0x69a   : > { %1056 = vst.msk [vmem:[#allocation2 + $0x24] sm:$0xf] %vm1025_vm2, %v1053_v5 }
 0x69c   : > { %v2617_v6 = vpop.eup %2616 }
 0x69d   : > { %v1337_v7 = vmul.f32 %v2617_v6, %v1325_v2  ;;  %v1097_v9 = vld [vmem:[#allocation2 + $0x28] sm:$0xf] }
 0x69e   : > { %v1457_v10 = vsel %vm1363_vm4, %v1097_v9, 0 }
 0x69f   : > { %v1341_v11 = vsub.f32 2.0, %v1337_v7  ;;  %2331 = vmatpush3.bf16.msra.mxu1 %v1457_v10 }
 0x6a0   : > { %v2619_v12 = vpop.eup %2618  ;;  %2342 = vmatprep.subr.bf16.mxu1 %v3232_v8 }
 0x6a1   : > { %v1345_v44 = vmul.f32 %v2617_v6, %v1341_v11  ;;  %v1338_v13 = vmul.f32 %v2619_v12, %v1328_v3  ;;  %v1096_v15 = vld [vmem:[#allocation2 + $0x24] sm:$0xf] }
 0x6a2   : > { %v1411_v17 = vsel %vm1363_vm4, %v1096_v15, 0  ;;  %v2598_v15 = vld [vmem:[#allocation27 + $0x10] sm:$0xff]  }
 0x6a3   : > { %v1349_v18 = vmul.f32 %v2609_v49, %v1345_v44  ;;  %v1342_v19 = vsub.f32 2.0, %v1338_v13  ;;  %2325 = vmatpush3.bf16.msra.mxu0 %v1411_v17  ;;  %v2595_v44 = vld [vmem:[#allocation24 + $0x8] sm:$0xff]   ;;  %v2597_v13 = vld [vmem:[#allocation27 + $0x8] sm:$0xff]  }
 0x6a4   : > { %2336 = vmatprep.subr.bf16.mxu0 %v3232_v8 }
 0x6a5   : > { %1353 = vst.msk [vmem:[%s3943_s3 + $0x8] sm:$0xff] %vm1099_vm3, %v1349_v18  ;;  %v1357_v20 = vpack.c.bf16 %v1349_v18, %v1349_v18  ;;  %v1346_v21 = vmul.f32 %v2619_v12, %v1342_v19  ;;  %v2594_v12 = vld [vmem:[#allocation24] sm:$0xff]  }
 0x6a7   : > { %v1350_v22 = vmul.f32 %v2611_v51, %v1346_v21  ;;  %2327 = vmatmul.mubr.msk.bf16.vlgmr.msra.gmra.mrb[20].mxu0 %vm1099_vm3, %v1357_v20  ;;  %v2593_v51 = vld [vmem:[#allocation21 + $0x8] sm:$0xff]  }
 0x6a8   : > { %2338 = vmatprep.mubr.msk.bf16.mxu0 %vm3233_vm1, %v3232_v8 }
 0x6a9   : > { %1354 = vst.msk [vmem:[%s3943_s3 + $0x10] sm:$0xff] %vm1099_vm3, %v1350_v22  ;;  %v1358_v23 = vpack.c.bf16 %v1350_v22, %v1350_v22 }
 0x6ab   : > { %2333 = vmatmul.mubr.msk.bf16.vlgmr.msra.gmra.mrb[12].mxu1 %vm1099_vm3, %v1358_v23 }
 0x6ac   : > { %2346 = vmatprep.mubr.msk.bf16.mxu1 %vm3233_vm1, %v3232_v8  ;;  %2343 = vmatpush3.bf16.msra.mxu1 %v2592_v50 }
 0x6ad   : > { %2344 = vmatprep.subr.bf16.mxu1 %v3232_v8 }
 0x6b0   : > { %2345 = vmatpush3.bf16.msra.mxu1 %v2593_v51 }
 0x6b1   : > { %2358 = vmatprep.subr.bf16.mxu1 %v3232_v8 }
 0x6c6   : > { %v1331_v24 = vpop.xlane.xlu1 %1330 }
 0x6c7   : > { %2620 = vrcp.f32 %v1331_v24 }
 0x6ca   : > { %v1083_v25 = vpop.permute.xlu1 %1082 }
 0x6cb   : > { %1086 = vst.msk [vmem:[#allocation2 + $0x2c] sm:$0xf] %vm1025_vm2, %v1083_v25  ;;  %v2599_v25 = vld [vmem:[#allocation27 + $0x18] sm:$0xff]  }
 0x6d1   : > { %v2621_v26 = vpop.eup %2620 }
 0x6d2   : > { %v1339_v27 = vmul.f32 %v2621_v26, %v1331_v24  ;;  %v1098_v28 = vld [vmem:[#allocation2 + $0x2c] sm:$0xf] }
 0x6d3   : > { %v1503_v29 = vsel %vm1363_vm4, %v1098_v28, 0  ;;  %v2602_v28 = vld [vmem:[#allocation27 + $0x30] sm:$0xff]  }
 0x6d4   : > { %v1343_v30 = vsub.f32 2.0, %v1339_v27  ;;  %2337 = vmatpush3.bf16.msra.mxu0 %v1503_v29  ;;  %v2601_v27 = vld [vmem:[#allocation27 + $0x28] sm:$0xff]  }
 0x6d5   : > { %2350 = vmatprep.subr.bf16.mxu0 %v3232_v8 }
 0x6d6   : > { %v1347_v31 = vmul.f32 %v2621_v26, %v1343_v30  ;;  %v2600_v26 = vld [vmem:[#allocation27 + $0x20] sm:$0xff]  }
 0x6d8   : > { %v1351_v32 = vmul.f32 %v2615_v63, %v1347_v31 }
 0x6da   : > { %1355 = vst.msk [vmem:[%s3943_s3 + $0x18] sm:$0xff] %vm1099_vm3, %v1351_v32  ;;  %v1359_v33 = vpack.c.bf16 %v1351_v32, %v1351_v32 }
 0x6dc   : > { %2339 = vmatmul.mubr.msk.bf16.vlgmr.msra.gmra.mrb[24].mxu0 %vm1099_vm3, %v1359_v33 }
 0x6dd   : > { %2354 = vmatprep.mubr.msk.bf16.mxu0 %vm3233_vm1, %v3232_v8  ;;  %2351 = vmatpush3.bf16.msra.mxu0 %v2594_v12 }
 0x6de   : > { %2352 = vmatprep.subr.bf16.mxu0 %v3232_v8 }
 0x6e1   : > { %2353 = vmatpush3.bf16.msra.mxu0 %v2595_v44 }
 0x707   : > { %v1401_v34 = vpop.f32.mrb[8].mxu1 }
 0x708   : > { %v1545_v35 = vpack.c.bf16 %v1401_v34, %v1401_v34  ;;  %v2322_v36 = vpop.f32.mrb[9].mxu1 }
 0x709   : > { %v1404_v37 = vpop.f32.mrb[10].mxu1 }
 0x70a   : > { %1546 = vst.msk [vmem:[#allocation3] sm:$0xf] %vm1025_vm2, %v1545_v35  ;;  %v2323_v38 = vpop.f32.mrb[11].mxu1 }
 0x77a   : > { %v1447_v39 = vpop.f32.mrb[20].mxu0 }
 0x77b   : > { %v2226_v40 = vpack.c.bf16 %v1447_v39, %v1447_v39  ;;  %v2328_v41 = vpop.f32.mrb[21].mxu0 }
 0x77c   : > { %v1450_v42 = vpop.f32.mrb[22].mxu0 }
 0x77d   : > { %1551 = vrot.lane.b32.xlu0 %v2226_v40, %s3237_s7  ;;  %v2329_v43 = vpop.f32.mrb[23].mxu0 }
 0x77e   : > { %v1493_v45 = vpop.f32.mrb[12].mxu1 }
 0x77f   : > { %v2227_v46 = vpack.c.bf16 %v1493_v45, %v1493_v45  ;;  %v2334_v47 = vpop.f32.mrb[13].mxu1 }
 0x780   : > { %v1496_v48 = vpop.f32.mrb[14].mxu1 }
 0x781   : > { %1560 = vrot.lane.b32.xlu1 %v2227_v46, %s3238_s4  ;;  %v2335_v49 = vpop.f32.mrb[15].mxu1  ;;  %s3240_s4 = smov [#allocation31]  }
 0x7af   : > { %v1539_v52 = vpop.f32.mrb[24].mxu0 }
 0x7b0   : > { %v2228_v53 = vpack.c.bf16 %v1539_v52, %v1539_v52  ;;  %v2340_v54 = vpop.f32.mrb[25].mxu0 }
 0x7b1   : > { %v1542_v55 = vpop.f32.mrb[26].mxu0 }
 0x7b2   : > { %1569 = vrot.lane.b32.xlu0 %v2228_v53, %s3239_s5  ;;  %v2341_v56 = vpop.f32.mrb[27].mxu0  ;;  %s3082_s5 = sshll.u32 %s3240_s4, 4  ;;  %s3083_s5 = int_to_ptr.vmem [resolvable:$false] %s3082_s5 }
 0x7b3   : > { %s3084_s3 = scalar_lea.vmem %s3083_s5, 1024  ;;  %p3085_p3 = scmp.lt.s32.totalorder %s4009_s21, %s3083_s5 }
 0x7b4   : > { %p3086_p2 = scmp.lt.s32.totalorder %s3084_s3, %s3078_s17 }
 0x7b6   : > { %p3087_p10 = por %p3086_p2, %p3085_p3 }
 0x7b8   : > { %p3088_p11 = pnand %p3087_p10, %p3081_p1 }
 0x7ef   : > { %v1552_v57 = vpop.permute.xlu0 %1551 }
 0x7f0   : > { %1555 = vst.msk [vmem:[#allocation3] sm:$0xf] %vm1554_vm5, %v1552_v57 }
 0x7f3   : > { %v1561_v58 = vpop.permute.xlu1 %1560 }
 0x7f4   : > { %1564 = vst.msk [vmem:[#allocation3] sm:$0xf] %vm1563_vm6, %v1561_v58 }
 0x824   : > { %v1570_v59 = vpop.permute.xlu0 %1569 }
 0x825   : > { %1573 = vst.msk [vmem:[#allocation3] sm:$0xf] %vm1572_vm7, %v1570_v59 }
 0x82c   : > { %v1574_v60 = vld [vmem:[#allocation3] sm:$0xf] }
 0x82d   : > { %2347 = vmatmul.mubr.msk.bf16.vlgmr.msra.gmra.mrb[16].mxu1 %vm801_vm0, %v1574_v60 }
 0x82e   : > { %2374 = vmatprep.mubr.msk.bf16.mxu1 %vm3233_vm1, %v3232_v8 }
 0x900   : > { %v1635_v62 = vpop.f32.mrb[16].mxu1 }
 0x901   : > { %v1636_v63 = vadd.f32 %v2199_v61, %v1635_v62  ;;  %v2348_v1 = vpop.f32.mrb[17].mxu1 }
 0x902   : > { %v1638_v2 = vpop.f32.mrb[18].mxu1 }
 0x903   : > { %v3985_v3 = vadd.f32 %v1636_v63, %v3856_v0  ;;  %v2349_v4 = vpop.f32.mrb[19].mxu1  ;;  %v2596_v0 = vld [vmem:[#allocation27] sm:$0xff]  }
 0x904   : > { %2359 = vmatpush3.bf16.msra.mxu1 %v2596_v0 }
 0x905   : > { %v1642_v5 = vsel %vm801_vm0, %v3985_v3, 0.0  ;;  %2360 = vmatprep.subr.bf16.mxu1 %v3232_v8 }
 0x906   : > { %1643 = vadd.xlane.f32.xlu1 %v1642_v5 }
 0x908   : > { %2361 = vmatpush3.bf16.msra.mxu1 %v2597_v13 }
 0x909   : > { %2362 = vmatprep.subr.bf16.mxu1 %v3232_v8 }
 0x90c   : > { %2363 = vmatpush3.bf16.msra.mxu1 %v2598_v15 }
 0x90d   : > { %2364 = vmatprep.subr.bf16.mxu1 %v3232_v8 }
 0x910   : > { %2365 = vmatpush3.bf16.msra.mxu1 %v2599_v25 }
 0x911   : > { %2366 = vmatprep.subr.bf16.mxu1 %v3232_v8 }
 0x914   : > { %2367 = vmatpush3.bf16.msra.mxu1 %v2600_v26 }
 0x915   : > { %2368 = vmatprep.subr.bf16.mxu1 %v3232_v8 }
 0x918   : > { %2369 = vmatpush3.bf16.msra.mxu1 %v2601_v27 }
 0x919   : > { %2370 = vmatprep.subr.bf16.mxu1 %v3232_v8 }
 0x91c   : > { %2371 = vmatpush3.bf16.msra.mxu1 %v2602_v28 }
 0x91d   : > { %2372 = vmatprep.subr.bf16.mxu1 %v3232_v8 }
 0x993   : > { %v1644_v6 = vpop.xlane.xlu1 %1643 }
 0x994   : > { %v1645_v7 = vmul.f32 0.03125, %v1644_v6 }
 0x996   : > { %v1646_v9 = vsub.f32 %v3985_v3, %v1645_v7 }
 0x998   : > { %v1647_v10 = vmul.f32 %v1646_v9, %v1646_v9 }
 0x99a   : > { %v1648_v11 = vsel %vm801_vm0, %v1647_v10, 0.0 }
 0x99b   : > { %1649 = vadd.xlane.f32.xlu0 %v1648_v11 }
 0xa28   : > { %v1650_v17 = vpop.xlane.xlu0 %1649 }
 0xa29   : > { %v1651_v18 = vmul.f32 0.03125, %v1650_v17 }
 0xa2b   : > { %v1652_v19 = vadd.f32 1e-12, %v1651_v18 }
 0xa2d   : > { %2622 = vrsqrt.f32 %v1652_v19 }
 0xa37   : > { %v2623_v20 = vpop.eup %2622 }
 0xa38   : > { %v1654_v21 = vmul.f32 %v2623_v20, %v1646_v9 }
 0xa3a   : > { %v1655_v22 = vmul.f32 %v3870_v14, %v1654_v21  ;;  %v2603_v14 = vld [vmem:[#allocation27 + $0x38] sm:$0xff]  }
 0xa3b   : > { %2373 = vmatpush3.bf16.msra.mxu1 %v2603_v14 }
 0xa3c   : > { %v1656_v23 = vadd.f32 %v3872_v16, %v1655_v22  ;;  %v2203_v16 = vld [vmem:[#allocation25] ss:$0 sm:$0xff] }
 0xa3e   : > { %v1657_v24 = vpack.c.bf16 %v1656_v23, %v1656_v23 }
 0xa40   : > { %2355 = vmatmul.mubr.msk.bf16.vlgmr.msra.gmra.mrb[28].mxu0 %vm801_vm0, %v1657_v24 }
 0xb13   : > { %v1718_v29 = vpop.f32.mrb[28].mxu0 }
 0xb14   : > { %v1719_v30 = vadd.f32 %v2203_v16, %v1718_v29  ;;  %v2356_v31 = vpop.f32.mrb[29].mxu0 }
 0xb15   : > { %v1721_v32 = vpop.f32.mrb[30].mxu0 }
 0xb16   : > { %v1725_v33 = vmul.f32 0.70710677, %v1719_v30  ;;  %v2357_v34 = vpop.f32.mrb[31].mxu0  ;;  %v1724_v36 = vmul.f32 0.5, %v1719_v30 }
 0xb18   : > { %2624 = verf.f32 %v1725_v33 }
 0xb22   : > { %v2625_v35 = vpop.eup %2624 }
 0xb23   : > { %v1727_v37 = vadd.f32 1.0, %v2625_v35 }
 0xb25   : > { %v1728_v38 = vmul.f32 %v1727_v37, %v1724_v36 }
 0xb27   : > { %v1729_v39 = vpack.c.bf16 %v1728_v38, %v1728_v38 }
 0xb29   : > { %2375 = vmatmul.mubr.bf16.vlgmr.msra.gmra.mrb[20].mxu1 %v1729_v39 }
 0xb2a   : > { %3091 = shalt.err (!%p3088_p11)
}
 0xb2b   : > { %s3092_s19 = scalar_lea.hbm %s4007_s29, 512  ;;  %s3096_s4 = scalar_lea.hbm %s4177_s0, 1024 }
 0xb2c   : > { %p3093_p5 = scmp.ne.s32.totalorder %s4007_s29, %s3092_s19  ;;  %p3097_p6 = scmp.lt.u32.totalorder %s4007_s29, %s4177_s0 }
 0xb2d   : > { %p3098_p12 = scmp.lt.u32.totalorder %s3096_s4, %s3092_s19  ;;  %p3100_p9 = scmp.lt.u32.totalorder %s3092_s19, %s4007_s29 }
 0xb2e   : > { %p3094_p7 = pnand %p3093_p5, %p4178_p4 }
 0xb2f   : > { %p3099_p8 = por %p3098_p12, %p3097_p6 }
 0xb30   : > { %p3095_p0 = pneg %p3094_p7 }
 0xb31   : > { %p3101_p13 = por %p3100_p9, %p3099_p8 }
 0xb33   : > { %p3102_p1 = pnand %p3101_p13, %p3095_p0 }
 0xb35   : > { %3105 = shalt.err (!%p3102_p1)
}
 0xb36   : > { %s3241_s17 = smov 128   ;;  %v2207_v8 = vld [vmem:[#allocation28] ss:$0 sm:$0xff]  ;;  %s2218_s16 = sshll.u32 %s4160_s22, 7 }
 0xb37   : > { %2439 = dma.vmem_to_hbm [thread:$0]  (%p4178_p4), %s4009_s21, 512, %s4007_s29, %s1849_s24, %s3241_s17, %s3241_s17, %s3237_s7  }
 0xb38   : > { %s4179_s3 = sshll.u32 %s3808_s2, 3  ;;  %s4180_s5 = sld [smem:[#allocation57_spill]] }
 0xb39   : > { %s788_s19 = scalar_lea.vmem [#allocation30], %s4179_s3  ;;  %s1844_s22 = scalar_lea.sflag [#allocation6], %s3808_s2 }
 0xb3a   : > { %s1862_s28 = sshll.u32 %s788_s19, 4  ;;  %s3242_s21 = smov [#allocation30]   ;;  %s4045_s28 = int_to_ptr.vmem [resolvable:$true] %s1862_s28 }
 0xb3b   : > { %s3106_s7 = scalar_lea.vmem %s4045_s28, 128  ;;  %s3110_s29 = sshll.u32 %s3242_s21, 4  ;;  %s3111_s29 = int_to_ptr.vmem [resolvable:$false] %s3110_s29 }
 0xb3c   : > { %p3107_p3 = scmp.ne.s32.totalorder %s4045_s28, %s3106_s7  ;;  %s3112_s24 = scalar_lea.vmem %s3111_s29, 256 }
 0xb3d   : > { %p3113_p11 = scmp.lt.s32.totalorder %s4045_s28, %s3111_s29  ;;  %p3114_p5 = scmp.lt.s32.totalorder %s3112_s24, %s3106_s7 }
 0xb3e   : > { %s4043_s0 = scalar_lea.hbm %s4180_s5, %s2218_s16  ;;  %p3108_p2 = pnand %p3107_p3, %p4178_p4 }
 0xb3f   : > { %p3115_p7 = por %p3114_p5, %p3113_p11 }
 0xb40   : > { %p3109_p10 = pneg %p3108_p2 }
 0xb42   : > { %p3116_p0 = pnand %p3115_p7, %p3109_p10 }
 0xbfc   : > { %v1835_v40 = vpop.f32.mrb[20].mxu1 }
 0xbfd   : > { %v1836_v41 = vadd.f32 %v2207_v8, %v1835_v40  ;;  %v2376_v42 = vpop.f32.mrb[21].mxu1 }
 0xbfe   : > { %v1838_v43 = vpop.f32.mrb[22].mxu1 }
 0xbff   : > { %v1841_v45 = vadd.f32 %v1836_v41, %v3985_v3  ;;  %v2377_v46 = vpop.f32.mrb[23].mxu1 }
 0xc01   : > { %1842 = vst.msk [vmem:[%s788_s19] sm:$0xff] %vm801_vm0, %v1841_v45 }
 0xc02   : > { %3119 = shalt.err (!%p3116_p0)
}
 0xc03   : > { %s3120_s2 = scalar_lea.hbm %s4043_s0, 128  ;;  %s3124_s3 = scalar_lea.hbm %s4180_s5, 256 }
 0xc04   : > { %p3121_p6 = scmp.ne.s32.totalorder %s4043_s0, %s3120_s2  ;;  %p3125_p9 = scmp.lt.u32.totalorder %s4043_s0, %s4180_s5 }
 0xc05   : > { %p3126_p13 = scmp.lt.u32.totalorder %s3124_s3, %s3120_s2  ;;  %p3128_p3 = scmp.lt.u32.totalorder %s3120_s2, %s4043_s0 }
 0xc06   : > { %p3122_p12 = pnand %p3121_p6, %p4178_p4 }
 0xc07   : > { %p3127_p1 = por %p3126_p13, %p3125_p9 }
 0xc08   : > { %p3123_p8 = pneg %p3122_p12 }
 0xc09   : > { %p3129_p2 = por %p3128_p3, %p3127_p1 }
 0xc0b   : > { %p3130_p10 = pnand %p3129_p2, %p3123_p8 }
 0xc0d   : > { %3133 = shalt.err (!%p3130_p10)
}
 0xc0e   : > { %2438 = dma.vmem_to_hbm [thread:$0]  (%p4178_p4), %s4045_s28, 128, %s4043_s0, %s1844_s22  }
 0xc0f PF: > { %s4181_s4 = sld [smem:[#allocation45_spill]]  ;;  %p4182_p11 = scmp.ne.s32.totalorder %s4151_s18, 0 }
 0xc10   : > { %p4183_p5 = scmp.ge.s32.totalorder %s3212_s27, 2 }
 0xc12   : > { %p2493_p7 = pnand %p4183_p5, %p4182_p11 }
 0xc15   : > { %s1890_s7 = sand.u32 1, %s4181_s4  }
 0xc16   : > { %s1891_s21 = scalar_lea.sflag [#allocation6], %s1890_s7 }
 0xc17   : > { %3191 = dma.done.wait (!%p2493_p7), %s1891_s21, 128  }
 0xc18   : > { %3193 = vsyncadd (!%p2493_p7), %s1891_s21, 4294967168  ;;  %s1900_s29 = scalar_lea.sflag [#allocation32], %s1890_s7 }
 0xc19   : > { %3195 = dma.done.wait (!%p2493_p7), %s1900_s29, 512  }
 0xc1a   : > { %3197 = vsyncadd (!%p2493_p7), %s1900_s29, 4294966784  ;;  %s4184_s24 = sld [smem:[#allocation46_spill]]  ;;  %p44_p4 = scmp.ge.s32.totalorder %s3699_s30, 4  }
 0xc1b   : > { %s4185_s25 = smov %s3208_s26  ;;  %s4186_s26 = smov %s3710_s20 }
 0xc1c   : > { %s4187_s27 = smov %s3699_s30  ;;  %46 = sbr.rel (!%p44_p4) target bundleno = 27 (0x1b), region = 226 }
 0xc23   :  { %1905 = vsyncpa [#allocation5], 1 }
 0xc24   :  { %1907 = vsyncpa [#allocation5 + $0x1], 1 }
 0xc25   :  { %1908 = vsyncpa [#allocation8], 1 }
 0xc26   :  { %1910 = vsyncpa [#allocation8 + $0x1], 1 }
 0xc27   :  { %1911 = vsyncpa [#allocation11], 1 }
 0xc28   :  { %1912 = vsyncpa [#allocation14], 1 }
 0xc29   :  { %1913 = vsyncpa [#allocation17], 1 }
 0xc2a   :  { %1914 = vsyncpa [#allocation20], 1 }
 0xc2b   :  { %1915 = vsyncpa [#allocation23], 1 }
 0xc2c   :  { %1916 = vsyncpa [#allocation26], 1 }
 0xc2d   :  { %1917 = vsyncpa [#allocation29], 1 }
 0xc2e   :  { %1918 = vsyncpa [#allocation6], 1 }
 0xc2f   :  { %1920 = vsyncpa [#allocation6 + $0x1], 1 }
 0xc30   :  { %1921 = vsyncpa [#allocation32], 1 }
 0xc31   :  { %1923 = vsyncpa [#allocation32 + $0x1], 1 }

</bundles_post_ra>
